<compile_context>
chip_gen: v6e
topology: v6e:2x2x1
jax: 0.10.0
libtpu: 0.0.40
codegen_flags: <defaults>
</compile_context>

<pallas_src>
import math

import jax
import jax.numpy as jnp
from jax.experimental import pallas as pl
from jax.experimental.pallas import tpu as pltpu


def _conv_bn_relu_pool(xp_ref, w_ref, scale_ref, shift_ref):
    """One fused layer: 3x3 conv as a single im2col matmul + BN + ReLU + (1,2) maxpool.

    xp_ref:    (W+2, H, Cin)  f32 scratch; the two W-halo columns are zero, H unpadded.
    w_ref:     (9*Cin, Cout)  bf16 im2col weights, flat index = (kw*3 + kh)*Cin + cin.
    scale_ref: (1, Cout)      f32 folded BN scale.
    shift_ref: (1, Cout)      f32 folded BN shift (includes conv bias).
    returns    (W//2, H, Cout) f32.
    """
    wp, h, cin = xp_ref.shape
    wdim = wp - 2
    cout = w_ref.shape[1]
    n = wp * h          # padded rows (flattened)
    m = wdim * h        # output rows (flattened)

    # Flatten to (Wp*H, Cin): row = w*H + h (H=8 -> free relayout), Cin -> lanes.
    x2 = xp_ref[...].reshape(n, cin)

    # kh = -1/+1 taps: one-row shifts of the flattened view (zero-row concat, the
    # direction-unambiguous equivalent of a sublane roll) + mask that zeroes the
    # rows which crossed a w-slab boundary.  This runs on XLU/VPU slots with slack.
    hrow = jax.lax.broadcasted_iota(jnp.int32, (wp, h, cin), 1).reshape(n, cin)
    zrow = jnp.zeros((1, cin), jnp.float32)
    up = jnp.where(hrow == 0, 0.0,
                   jnp.concatenate([zrow, x2[:n - 1]], axis=0))   # input(h-1)
    dn = jnp.where(hrow == h - 1, 0.0,
                   jnp.concatenate([x2[1:], zrow], axis=0))       # input(h+1)

    # kw = -1/0/+1 taps are plain row windows of the W-padded buffer (offsets kw*H,
    # sublane-tile aligned for H=8).  im2col: lane-concat all 9 taps so the whole
    # 3x3xCin contraction is a single MXU matmul with K = 9*Cin.
    taps = []
    for kw in range(3):
        lo = kw * h
        taps += [up[lo:lo + m], x2[lo:lo + m], dn[lo:lo + m]]     # kh = 0, 1, 2
    patch = jnp.concatenate(taps, axis=-1).astype(w_ref.dtype)    # (W*H, 9*Cin) bf16

    # Single bf16 MXU dot per layer, f32 accumulation.
    acc = jnp.dot(patch, w_ref[...], preferred_element_type=jnp.float32)

    # Folded BN + ReLU in f32, then MaxPool2d((1,2)) over W: leading-dim regroup + max.
    y = jnp.maximum(acc * scale_ref[...] + shift_ref[...], 0.0)   # (W*H, Cout)
    y = y.reshape(wdim // 2, 2, h, cout)
    return jnp.maximum(y[:, 0], y[:, 1])                          # (W//2, H, Cout)


def fused_cnn_kernel(x_ref,
                     w1_ref, s1_ref, b1_ref,
                     w2_ref, s2_ref, b2_ref,
                     w3_ref, s3_ref, b3_ref,
                     o_ref,
                     p1_ref, p2_ref, p3_ref):
    # Zero only the two W-halo columns of each scratch buffer; interiors are fully
    # overwritten below.  (~2 KB of stores per step vs ~46 KB for full-buffer zeroing.)
    # Not hoisted under @pl.when(program_id == 0): the batch grid axis is "parallel",
    # so with 2 TensorCores each core owns its own scratch and only one sees pid == 0.
    for p_ref in (p1_ref, p2_ref, p3_ref):
        halo = jnp.zeros(p_ref.shape[1:], p_ref.dtype)
        p_ref[0] = halo
        p_ref[p_ref.shape[0] - 1] = halo

    def place(val, p_ref):
        # Interior store at leading-dim offset 1; the two minor dims (H, C) are
        # untouched, so the store is (8,128)-aligned.
        p_ref[1:1 + val.shape[0], :, :] = val

    # TODO(synk): layer 1 could read x_ref directly (skipping this ~8 KB copy) with a
    # leading-dim halo mask; kept as a copy for simplicity.
    place(x_ref[0], p1_ref)
    place(_conv_bn_relu_pool(p1_ref, w1_ref, s1_ref, b1_ref), p2_ref)
    place(_conv_bn_relu_pool(p2_ref, w2_ref, s2_ref, b2_ref), p3_ref)
    o_ref[0] = _conv_bn_relu_pool(p3_ref, w3_ref, s3_ref, b3_ref).astype(o_ref.dtype)


def cnn_block_forward(x_nchw, params):
    """Forward of CNN_block. Input/Output in PyTorch NCHW convention."""
    x = jnp.transpose(x_nchw, (0, 3, 2, 1))   # NCHW -> NWHC (C -> lanes, H -> sublanes)
    n, w, h, c0 = x.shape
    c1 = params[0]["w_mxu"].shape[-1]
    c2 = params[1]["w_mxu"].shape[-1]
    c3 = params[2]["w_mxu"].shape[-1]
    # Three (1,2) max-pools over W -> W must be divisible by 8 (fail loudly otherwise).
    assert w % 8 == 0, f"W={w} must be divisible by 8 for three (1,2) max-pools"
    w1o, w2o, w3o = w // 2, w // 4, w // 8

    out_nwhc = pl.pallas_call(
        fused_cnn_kernel,
        out_shape=jax.ShapeDtypeStruct((n, w3o, h, c3), jnp.float32),
        grid_spec=pltpu.PrefetchScalarGridSpec(
            num_scalar_prefetch=0,
            grid=(n,),
            in_specs=[
                pl.BlockSpec((1, w, h, c0), lambda b: (b, 0, 0, 0)),
                pl.BlockSpec((9 * c0, c1), lambda b: (0, 0)),
                pl.BlockSpec((1, c1), lambda b: (0, 0)),
                pl.BlockSpec((1, c1), lambda b: (0, 0)),
                pl.BlockSpec((9 * c1, c2), lambda b: (0, 0)),
                pl.BlockSpec((1, c2), lambda b: (0, 0)),
                pl.BlockSpec((1, c2), lambda b: (0, 0)),
                pl.BlockSpec((9 * c2, c3), lambda b: (0, 0)),
                pl.BlockSpec((1, c3), lambda b: (0, 0)),
                pl.BlockSpec((1, c3), lambda b: (0, 0)),
            ],
            out_specs=pl.BlockSpec((1, w3o, h, c3), lambda b: (b, 0, 0, 0)),
            scratch_shapes=[
                pltpu.VMEM((w + 2, h, c0), jnp.float32),     # W-padded layer-1 input
                pltpu.VMEM((w1o + 2, h, c1), jnp.float32),   # W-padded layer-2 input
                pltpu.VMEM((w2o + 2, h, c2), jnp.float32),   # W-padded layer-3 input
            ],
        ),
        compiler_params=pltpu.CompilerParams(
            dimension_semantics=("parallel",)),   # batch axis -> both TCs on v7x
    )(x,
      params[0]["w_mxu"], params[0]["scale"], params[0]["shift"],
      params[1]["w_mxu"], params[1]["scale"], params[1]["shift"],
      params[2]["w_mxu"], params[2]["scale"], params[2]["shift"])

    return jnp.transpose(out_nwhc, (0, 3, 2, 1))  # NWHC -> NCHW


def init_params(key):
    """Deterministic parameters matching the PyTorch module's shapes / init scheme."""
    specs = [(16, 48), (48, 64), (64, 128)]
    eps = 1e-5
    params = []
    for i, (cin, cout) in enumerate(specs):
        kw_, kb_ = jax.random.split(jax.random.fold_in(key, i))
        fan_in = cin * 3 * 3
        bound = 1.0 / math.sqrt(fan_in)
        w_pt = jax.random.uniform(kw_, (cout, cin, 3, 3), jnp.float32, -bound, bound)
        bias = jax.random.uniform(kb_, (cout,), jnp.float32, -bound, bound)
        # PyTorch BatchNorm2d defaults: gamma=1, beta=0, running_mean=0, running_var=1.
        gamma = jnp.ones((cout,), jnp.float32)
        beta = jnp.zeros((cout,), jnp.float32)
        running_mean = jnp.zeros((cout,), jnp.float32)
        running_var = jnp.ones((cout,), jnp.float32)
        scale = gamma / jnp.sqrt(running_var + eps)
        shift = (bias - running_mean) * scale + beta
        # (Cout, Cin, kh, kw) -> (kw, kh, Cin, Cout) -> (9*Cin, Cout), bf16 MXU operand.
        # Flat index (kw*3 + kh)*Cin + cin matches the in-kernel im2col lane order.
        w_mxu = jnp.transpose(w_pt, (3, 2, 1, 0)).reshape(9 * cin, cout).astype(jnp.bfloat16)
        params.append(dict(w_pt=w_pt, w_mxu=w_mxu,
                           scale=scale.reshape(1, cout),
                           shift=shift.reshape(1, cout)))
    return params


def ref_forward(x_nchw, params):
    """Pure-JAX reference (f32 XLA conv) for correctness checking."""
    y = x_nchw
    for p in params:
        y = jax.lax.conv_general_dilated(
            y, p["w_pt"], window_strides=(1, 1), padding=((1, 1), (1, 1)),
            dimension_numbers=("NCHW", "OIHW", "NCHW"))
        y = y * p["scale"].reshape(1, -1, 1, 1) + p["shift"].reshape(1, -1, 1, 1)
        y = jnp.maximum(y, 0.0)
        n, c, h, w = y.shape
        y = y.reshape(n, c, h, w // 2, 2).max(axis=-1)
    return y


if __name__ == "__main__":
    key = jax.random.PRNGKey(0)
    kx, kp = jax.random.split(key)

    # NCHW input: batch=2, in_channels=16 (module requirement), H=8, W=16.
    x = jax.random.normal(kx, (2, 16, 8, 16), jnp.float32)
    params = init_params(kp)

    out = jax.block_until_ready(cnn_block_forward(x, params))
    assert out.shape == (2, 128, 8, 2), out.shape

    ref = jax.block_until_ready(ref_forward(x, params))
    # bf16 MXU operands -> tolerance loosened vs. the f32 XLA reference.
    max_err = float(jnp.max(jnp.abs(out - ref)))
    assert jnp.allclose(out, ref, atol=3e-2, rtol=3e-2), max_err

    print("KERNEL_OK")
</pallas_src>

<mosaic_0001>
module attributes {stable_mosaic.version = 11 : i64} {
  func.func @fused_cnn_kernel(%arg0: i32, %arg1: memref<1x16x8x16xf32, #tpu.memory_space<vmem>>, %arg2: memref<144x48xbf16, #tpu.memory_space<vmem>>, %arg3: memref<1x48xf32, #tpu.memory_space<vmem>>, %arg4: memref<1x48xf32, #tpu.memory_space<vmem>>, %arg5: memref<432x64xbf16, #tpu.memory_space<vmem>>, %arg6: memref<1x64xf32, #tpu.memory_space<vmem>>, %arg7: memref<1x64xf32, #tpu.memory_space<vmem>>, %arg8: memref<576x128xbf16, #tpu.memory_space<vmem>>, %arg9: memref<1x128xf32, #tpu.memory_space<vmem>>, %arg10: memref<1x128xf32, #tpu.memory_space<vmem>>, %arg11: memref<1x2x8x128xf32, #tpu.memory_space<vmem>>, %arg12: memref<18x8x16xf32, #tpu.memory_space<vmem>>, %arg13: memref<10x8x48xf32, #tpu.memory_space<vmem>>, %arg14: memref<6x8x64xf32, #tpu.memory_space<vmem>>) attributes {dimension_semantics = [#tpu.dimension_semantics<parallel>], iteration_bounds = array<i64: 2>, scalar_prefetch = 0 : i64, scratch_operands = 3 : i64, tpu.core_type = #tpu.core_type<tc>, window_params = [{transform_indices = @transform_0, window_bounds = array<i64: 1, 16, 8, 16>}, {pipeline_mode = #tpu.pipeline_mode<synchronous>, transform_indices = @transform_1, window_bounds = array<i64: 144, 48>}, {pipeline_mode = #tpu.pipeline_mode<synchronous>, transform_indices = @transform_2, window_bounds = array<i64: 1, 48>}, {pipeline_mode = #tpu.pipeline_mode<synchronous>, transform_indices = @transform_3, window_bounds = array<i64: 1, 48>}, {pipeline_mode = #tpu.pipeline_mode<synchronous>, transform_indices = @transform_4, window_bounds = array<i64: 432, 64>}, {pipeline_mode = #tpu.pipeline_mode<synchronous>, transform_indices = @transform_5, window_bounds = array<i64: 1, 64>}, {pipeline_mode = #tpu.pipeline_mode<synchronous>, transform_indices = @transform_6, window_bounds = array<i64: 1, 64>}, {pipeline_mode = #tpu.pipeline_mode<synchronous>, transform_indices = @transform_7, window_bounds = array<i64: 576, 128>}, {pipeline_mode = #tpu.pipeline_mode<synchronous>, transform_indices = @transform_8, window_bounds = array<i64: 1, 128>}, {pipeline_mode = #tpu.pipeline_mode<synchronous>, transform_indices = @transform_9, window_bounds = array<i64: 1, 128>}, {transform_indices = @transform_10, window_bounds = array<i64: 1, 2, 8, 128>}]} {
    %cst = arith.constant 0.000000e+00 : f32
    %0 = vector.broadcast %cst : f32 to vector<8x16xf32>
    %c0 = arith.constant 0 : index
    %c0_0 = arith.constant 0 : index
    %c0_1 = arith.constant 0 : index
    %1 = vector.load %arg12[%c0, %c0_0, %c0_1] : memref<18x8x16xf32, #tpu.memory_space<vmem>>, vector<1x8x16xf32>
    %2 = vector.shape_cast %1 : vector<1x8x16xf32> to vector<8x16xf32>
    %3 = vector.shape_cast %0 : vector<8x16xf32> to vector<1x8x16xf32>
    tpu.vector_store %arg12[%c0, %c0_0, %c0_1], %3 {strides = array<i32>} : memref<18x8x16xf32, #tpu.memory_space<vmem>>, vector<1x8x16xf32>,
    %c17 = arith.constant 17 : index
    %c0_2 = arith.constant 0 : index
    %c0_3 = arith.constant 0 : index
    %4 = vector.load %arg12[%c17, %c0_2, %c0_3] : memref<18x8x16xf32, #tpu.memory_space<vmem>>, vector<1x8x16xf32>
    %5 = vector.shape_cast %4 : vector<1x8x16xf32> to vector<8x16xf32>
    %6 = vector.shape_cast %0 : vector<8x16xf32> to vector<1x8x16xf32>
    tpu.vector_store %arg12[%c17, %c0_2, %c0_3], %6 {strides = array<i32>} : memref<18x8x16xf32, #tpu.memory_space<vmem>>, vector<1x8x16xf32>,
    %cst_4 = arith.constant 0.000000e+00 : f32
    %7 = vector.broadcast %cst_4 : f32 to vector<8x48xf32>
    %c0_5 = arith.constant 0 : index
    %c0_6 = arith.constant 0 : index
    %c0_7 = arith.constant 0 : index
    %8 = vector.load %arg13[%c0_5, %c0_6, %c0_7] : memref<10x8x48xf32, #tpu.memory_space<vmem>>, vector<1x8x48xf32>
    %9 = vector.shape_cast %8 : vector<1x8x48xf32> to vector<8x48xf32>
    %10 = vector.shape_cast %7 : vector<8x48xf32> to vector<1x8x48xf32>
    tpu.vector_store %arg13[%c0_5, %c0_6, %c0_7], %10 {strides = array<i32>} : memref<10x8x48xf32, #tpu.memory_space<vmem>>, vector<1x8x48xf32>,
    %c9 = arith.constant 9 : index
    %c0_8 = arith.constant 0 : index
    %c0_9 = arith.constant 0 : index
    %11 = vector.load %arg13[%c9, %c0_8, %c0_9] : memref<10x8x48xf32, #tpu.memory_space<vmem>>, vector<1x8x48xf32>
    %12 = vector.shape_cast %11 : vector<1x8x48xf32> to vector<8x48xf32>
    %13 = vector.shape_cast %7 : vector<8x48xf32> to vector<1x8x48xf32>
    tpu.vector_store %arg13[%c9, %c0_8, %c0_9], %13 {strides = array<i32>} : memref<10x8x48xf32, #tpu.memory_space<vmem>>, vector<1x8x48xf32>,
    %cst_10 = arith.constant 0.000000e+00 : f32
    %14 = vector.broadcast %cst_10 : f32 to vector<8x64xf32>
    %c0_11 = arith.constant 0 : index
    %c0_12 = arith.constant 0 : index
    %c0_13 = arith.constant 0 : index
    %15 = vector.load %arg14[%c0_11, %c0_12, %c0_13] : memref<6x8x64xf32, #tpu.memory_space<vmem>>, vector<1x8x64xf32>
    %16 = vector.shape_cast %15 : vector<1x8x64xf32> to vector<8x64xf32>
    %17 = vector.shape_cast %14 : vector<8x64xf32> to vector<1x8x64xf32>
    tpu.vector_store %arg14[%c0_11, %c0_12, %c0_13], %17 {strides = array<i32>} : memref<6x8x64xf32, #tpu.memory_space<vmem>>, vector<1x8x64xf32>,
    %c5 = arith.constant 5 : index
    %c0_14 = arith.constant 0 : index
    %c0_15 = arith.constant 0 : index
    %18 = vector.load %arg14[%c5, %c0_14, %c0_15] : memref<6x8x64xf32, #tpu.memory_space<vmem>>, vector<1x8x64xf32>
    %19 = vector.shape_cast %18 : vector<1x8x64xf32> to vector<8x64xf32>
    %20 = vector.shape_cast %14 : vector<8x64xf32> to vector<1x8x64xf32>
    tpu.vector_store %arg14[%c5, %c0_14, %c0_15], %20 {strides = array<i32>} : memref<6x8x64xf32, #tpu.memory_space<vmem>>, vector<1x8x64xf32>,
    %c0_16 = arith.constant 0 : index
    %c0_17 = arith.constant 0 : index
    %c0_18 = arith.constant 0 : index
    %c0_19 = arith.constant 0 : index
    %21 = vector.load %arg1[%c0_16, %c0_17, %c0_18, %c0_19] : memref<1x16x8x16xf32, #tpu.memory_space<vmem>>, vector<1x16x8x16xf32>
    %22 = vector.shape_cast %21 : vector<1x16x8x16xf32> to vector<16x8x16xf32>
    %c1 = arith.constant 1 : index
    %c0_20 = arith.constant 0 : index
    %c0_21 = arith.constant 0 : index
    %23 = vector.load %arg12[%c1, %c0_20, %c0_21] : memref<18x8x16xf32, #tpu.memory_space<vmem>>, vector<16x8x16xf32>
    tpu.vector_store %arg12[%c1, %c0_20, %c0_21], %22 {strides = array<i32>} : memref<18x8x16xf32, #tpu.memory_space<vmem>>, vector<16x8x16xf32>,
    %c0_22 = arith.constant 0 : index
    %c0_23 = arith.constant 0 : index
    %c0_24 = arith.constant 0 : index
    %24 = vector.load %arg12[%c0_22, %c0_23, %c0_24] : memref<18x8x16xf32, #tpu.memory_space<vmem>>, vector<18x8x16xf32>
    %25 = vector.shape_cast %24 : vector<18x8x16xf32> to vector<144x16xf32>
    %26 = tpu.iota {dimensions = array<i32: 1>} : vector<18x8x16xi32>
    %27 = vector.shape_cast %26 : vector<18x8x16xi32> to vector<144x16xi32>
    %cst_25 = arith.constant 0.000000e+00 : f32
    %28 = vector.broadcast %cst_25 : f32 to vector<1x16xf32>
    %c0_i32 = arith.constant 0 : i32
    %29 = vector.broadcast %c0_i32 : i32 to vector<144x16xi32>
    %30 = arith.cmpi eq, %27, %29 : vector<144x16xi32>
    %31 = vector.extract_strided_slice %25 {offsets = [0, 0], sizes = [143, 16], strides = [1, 1]} : vector<144x16xf32> to vector<143x16xf32>
    %32 = tpu.concatenate %28, %31 in 0 : vector<1x16xf32>, vector<143x16xf32> -> vector<144x16xf32>
    %cst_26 = arith.constant 0.000000e+00 : f32
    %33 = vector.broadcast %cst_26 : f32 to vector<144x16xf32>
    %34 = arith.select %30, %33, %32 : vector<144x16xi1>, vector<144x16xf32>
    %c7_i32 = arith.constant 7 : i32
    %35 = vector.broadcast %c7_i32 : i32 to vector<144x16xi32>
    %36 = arith.cmpi eq, %27, %35 : vector<144x16xi32>
    %37 = vector.extract_strided_slice %25 {offsets = [1, 0], sizes = [143, 16], strides = [1, 1]} : vector<144x16xf32> to vector<143x16xf32>
    %38 = tpu.concatenate %37, %28 in 0 : vector<143x16xf32>, vector<1x16xf32> -> vector<144x16xf32>
    %cst_27 = arith.constant 0.000000e+00 : f32
    %39 = vector.broadcast %cst_27 : f32 to vector<144x16xf32>
    %40 = arith.select %36, %39, %38 : vector<144x16xi1>, vector<144x16xf32>
    %41 = vector.extract_strided_slice %34 {offsets = [0, 0], sizes = [128, 16], strides = [1, 1]} : vector<144x16xf32> to vector<128x16xf32>
    %42 = vector.extract_strided_slice %25 {offsets = [0, 0], sizes = [128, 16], strides = [1, 1]} : vector<144x16xf32> to vector<128x16xf32>
    %43 = vector.extract_strided_slice %40 {offsets = [0, 0], sizes = [128, 16], strides = [1, 1]} : vector<144x16xf32> to vector<128x16xf32>
    %44 = vector.extract_strided_slice %34 {offsets = [8, 0], sizes = [128, 16], strides = [1, 1]} : vector<144x16xf32> to vector<128x16xf32>
    %45 = vector.extract_strided_slice %25 {offsets = [8, 0], sizes = [128, 16], strides = [1, 1]} : vector<144x16xf32> to vector<128x16xf32>
    %46 = vector.extract_strided_slice %40 {offsets = [8, 0], sizes = [128, 16], strides = [1, 1]} : vector<144x16xf32> to vector<128x16xf32>
    %47 = vector.extract_strided_slice %34 {offsets = [16, 0], sizes = [128, 16], strides = [1, 1]} : vector<144x16xf32> to vector<128x16xf32>
    %48 = vector.extract_strided_slice %25 {offsets = [16, 0], sizes = [128, 16], strides = [1, 1]} : vector<144x16xf32> to vector<128x16xf32>
    %49 = vector.extract_strided_slice %40 {offsets = [16, 0], sizes = [128, 16], strides = [1, 1]} : vector<144x16xf32> to vector<128x16xf32>
    %50 = tpu.concatenate %41, %42, %43, %44, %45, %46, %47, %48, %49 in 1 : vector<128x16xf32>, vector<128x16xf32>, vector<128x16xf32>, vector<128x16xf32>, vector<128x16xf32>, vector<128x16xf32>, vector<128x16xf32>, vector<128x16xf32>, vector<128x16xf32> -> vector<128x144xf32>
    %51 = arith.truncf %50 : vector<128x144xf32> to vector<128x144xbf16>
    %c0_28 = arith.constant 0 : index
    %c0_29 = arith.constant 0 : index
    %52 = vector.load %arg2[%c0_28, %c0_29] : memref<144x48xbf16, #tpu.memory_space<vmem>>, vector<144x48xbf16>
    %cst_30 = arith.constant dense<0.000000e+00> : vector<128x48xf32>
    %53 = tpu.matmul %51, %52, %cst_30 {dimension_numbers = #tpu.dot_dimension_numbers<[1], [0], [0], [1], [0, 0, 1, 1], [], []>} : vector<128x144xbf16>, vector<144x48xbf16>, vector<128x48xf32> -> vector<128x48xf32>
    %c0_31 = arith.constant 0 : index
    %c0_32 = arith.constant 0 : index
    %54 = vector.load %arg3[%c0_31, %c0_32] : memref<1x48xf32, #tpu.memory_space<vmem>>, vector<1x48xf32>
    %55 = vector.broadcast %54 : vector<1x48xf32> to vector<128x48xf32>
    %56 = arith.mulf %53, %55 : vector<128x48xf32>
    %c0_33 = arith.constant 0 : index
    %c0_34 = arith.constant 0 : index
    %57 = vector.load %arg4[%c0_33, %c0_34] : memref<1x48xf32, #tpu.memory_space<vmem>>, vector<1x48xf32>
    %58 = vector.broadcast %57 : vector<1x48xf32> to vector<128x48xf32>
    %59 = arith.addf %56, %58 : vector<128x48xf32>
    %cst_35 = arith.constant 0.000000e+00 : f32
    %60 = vector.broadcast %cst_35 : f32 to vector<128x48xf32>
    %61 = arith.maximumf %59, %60 : vector<128x48xf32>
    %62 = vector.shape_cast %61 : vector<128x48xf32> to vector<8x2x8x48xf32>
    %63 = vector.extract_strided_slice %62 {offsets = [0, 0, 0, 0], sizes = [8, 1, 8, 48], strides = [1, 1, 1, 1]} : vector<8x2x8x48xf32> to vector<8x1x8x48xf32>
    %64 = vector.shape_cast %63 : vector<8x1x8x48xf32> to vector<8x8x48xf32>
    %65 = vector.extract_strided_slice %62 {offsets = [0, 1, 0, 0], sizes = [8, 1, 8, 48], strides = [1, 1, 1, 1]} : vector<8x2x8x48xf32> to vector<8x1x8x48xf32>
    %66 = vector.shape_cast %65 : vector<8x1x8x48xf32> to vector<8x8x48xf32>
    %67 = arith.maximumf %64, %66 : vector<8x8x48xf32>
    %c1_36 = arith.constant 1 : index
    %c0_37 = arith.constant 0 : index
    %c0_38 = arith.constant 0 : index
    %68 = vector.load %arg13[%c1_36, %c0_37, %c0_38] : memref<10x8x48xf32, #tpu.memory_space<vmem>>, vector<8x8x48xf32>
    tpu.vector_store %arg13[%c1_36, %c0_37, %c0_38], %67 {strides = array<i32>} : memref<10x8x48xf32, #tpu.memory_space<vmem>>, vector<8x8x48xf32>,
    %c0_39 = arith.constant 0 : index
    %c0_40 = arith.constant 0 : index
    %c0_41 = arith.constant 0 : index
    %69 = vector.load %arg13[%c0_39, %c0_40, %c0_41] : memref<10x8x48xf32, #tpu.memory_space<vmem>>, vector<10x8x48xf32>
    %70 = vector.shape_cast %69 : vector<10x8x48xf32> to vector<80x48xf32>
    %71 = tpu.iota {dimensions = array<i32: 1>} : vector<10x8x48xi32>
    %72 = vector.shape_cast %71 : vector<10x8x48xi32> to vector<80x48xi32>
    %cst_42 = arith.constant 0.000000e+00 : f32
    %73 = vector.broadcast %cst_42 : f32 to vector<1x48xf32>
    %c0_i32_43 = arith.constant 0 : i32
    %74 = vector.broadcast %c0_i32_43 : i32 to vector<80x48xi32>
    %75 = arith.cmpi eq, %72, %74 : vector<80x48xi32>
    %76 = vector.extract_strided_slice %70 {offsets = [0, 0], sizes = [79, 48], strides = [1, 1]} : vector<80x48xf32> to vector<79x48xf32>
    %77 = tpu.concatenate %73, %76 in 0 : vector<1x48xf32>, vector<79x48xf32> -> vector<80x48xf32>
    %cst_44 = arith.constant 0.000000e+00 : f32
    %78 = vector.broadcast %cst_44 : f32 to vector<80x48xf32>
    %79 = arith.select %75, %78, %77 : vector<80x48xi1>, vector<80x48xf32>
    %c7_i32_45 = arith.constant 7 : i32
    %80 = vector.broadcast %c7_i32_45 : i32 to vector<80x48xi32>
    %81 = arith.cmpi eq, %72, %80 : vector<80x48xi32>
    %82 = vector.extract_strided_slice %70 {offsets = [1, 0], sizes = [79, 48], strides = [1, 1]} : vector<80x48xf32> to vector<79x48xf32>
    %83 = tpu.concatenate %82, %73 in 0 : vector<79x48xf32>, vector<1x48xf32> -> vector<80x48xf32>
    %cst_46 = arith.constant 0.000000e+00 : f32
    %84 = vector.broadcast %cst_46 : f32 to vector<80x48xf32>
    %85 = arith.select %81, %84, %83 : vector<80x48xi1>, vector<80x48xf32>
    %86 = vector.extract_strided_slice %79 {offsets = [0, 0], sizes = [64, 48], strides = [1, 1]} : vector<80x48xf32> to vector<64x48xf32>
    %87 = vector.extract_strided_slice %70 {offsets = [0, 0], sizes = [64, 48], strides = [1, 1]} : vector<80x48xf32> to vector<64x48xf32>
    %88 = vector.extract_strided_slice %85 {offsets = [0, 0], sizes = [64, 48], strides = [1, 1]} : vector<80x48xf32> to vector<64x48xf32>
    %89 = vector.extract_strided_slice %79 {offsets = [8, 0], sizes = [64, 48], strides = [1, 1]} : vector<80x48xf32> to vector<64x48xf32>
    %90 = vector.extract_strided_slice %70 {offsets = [8, 0], sizes = [64, 48], strides = [1, 1]} : vector<80x48xf32> to vector<64x48xf32>
    %91 = vector.extract_strided_slice %85 {offsets = [8, 0], sizes = [64, 48], strides = [1, 1]} : vector<80x48xf32> to vector<64x48xf32>
    %92 = vector.extract_strided_slice %79 {offsets = [16, 0], sizes = [64, 48], strides = [1, 1]} : vector<80x48xf32> to vector<64x48xf32>
    %93 = vector.extract_strided_slice %70 {offsets = [16, 0], sizes = [64, 48], strides = [1, 1]} : vector<80x48xf32> to vector<64x48xf32>
    %94 = vector.extract_strided_slice %85 {offsets = [16, 0], sizes = [64, 48], strides = [1, 1]} : vector<80x48xf32> to vector<64x48xf32>
    %95 = tpu.concatenate %86, %87, %88, %89, %90, %91, %92, %93, %94 in 1 : vector<64x48xf32>, vector<64x48xf32>, vector<64x48xf32>, vector<64x48xf32>, vector<64x48xf32>, vector<64x48xf32>, vector<64x48xf32>, vector<64x48xf32>, vector<64x48xf32> -> vector<64x432xf32>
    %96 = arith.truncf %95 : vector<64x432xf32> to vector<64x432xbf16>
    %c0_47 = arith.constant 0 : index
    %c0_48 = arith.constant 0 : index
    %97 = vector.load %arg5[%c0_47, %c0_48] : memref<432x64xbf16, #tpu.memory_space<vmem>>, vector<432x64xbf16>
    %cst_49 = arith.constant dense<0.000000e+00> : vector<64x64xf32>
    %98 = tpu.matmul %96, %97, %cst_49 {dimension_numbers = #tpu.dot_dimension_numbers<[1], [0], [0], [1], [0, 0, 1, 1], [], []>} : vector<64x432xbf16>, vector<432x64xbf16>, vector<64x64xf32> -> vector<64x64xf32>
    %c0_50 = arith.constant 0 : index
    %c0_51 = arith.constant 0 : index
    %99 = vector.load %arg6[%c0_50, %c0_51] : memref<1x64xf32, #tpu.memory_space<vmem>>, vector<1x64xf32>
    %100 = vector.broadcast %99 : vector<1x64xf32> to vector<64x64xf32>
    %101 = arith.mulf %98, %100 : vector<64x64xf32>
    %c0_52 = arith.constant 0 : index
    %c0_53 = arith.constant 0 : index
    %102 = vector.load %arg7[%c0_52, %c0_53] : memref<1x64xf32, #tpu.memory_space<vmem>>, vector<1x64xf32>
    %103 = vector.broadcast %102 : vector<1x64xf32> to vector<64x64xf32>
    %104 = arith.addf %101, %103 : vector<64x64xf32>
    %cst_54 = arith.constant 0.000000e+00 : f32
    %105 = vector.broadcast %cst_54 : f32 to vector<64x64xf32>
    %106 = arith.maximumf %104, %105 : vector<64x64xf32>
    %107 = vector.shape_cast %106 : vector<64x64xf32> to vector<4x2x8x64xf32>
    %108 = vector.extract_strided_slice %107 {offsets = [0, 0, 0, 0], sizes = [4, 1, 8, 64], strides = [1, 1, 1, 1]} : vector<4x2x8x64xf32> to vector<4x1x8x64xf32>
    %109 = vector.shape_cast %108 : vector<4x1x8x64xf32> to vector<4x8x64xf32>
    %110 = vector.extract_strided_slice %107 {offsets = [0, 1, 0, 0], sizes = [4, 1, 8, 64], strides = [1, 1, 1, 1]} : vector<4x2x8x64xf32> to vector<4x1x8x64xf32>
    %111 = vector.shape_cast %110 : vector<4x1x8x64xf32> to vector<4x8x64xf32>
    %112 = arith.maximumf %109, %111 : vector<4x8x64xf32>
    %c1_55 = arith.constant 1 : index
    %c0_56 = arith.constant 0 : index
    %c0_57 = arith.constant 0 : index
    %113 = vector.load %arg14[%c1_55, %c0_56, %c0_57] : memref<6x8x64xf32, #tpu.memory_space<vmem>>, vector<4x8x64xf32>
    tpu.vector_store %arg14[%c1_55, %c0_56, %c0_57], %112 {strides = array<i32>} : memref<6x8x64xf32, #tpu.memory_space<vmem>>, vector<4x8x64xf32>,
    %c0_58 = arith.constant 0 : index
    %c0_59 = arith.constant 0 : index
    %c0_60 = arith.constant 0 : index
    %114 = vector.load %arg14[%c0_58, %c0_59, %c0_60] : memref<6x8x64xf32, #tpu.memory_space<vmem>>, vector<6x8x64xf32>
    %115 = vector.shape_cast %114 : vector<6x8x64xf32> to vector<48x64xf32>
    %116 = tpu.iota {dimensions = array<i32: 1>} : vector<6x8x64xi32>
    %117 = vector.shape_cast %116 : vector<6x8x64xi32> to vector<48x64xi32>
    %cst_61 = arith.constant 0.000000e+00 : f32
    %118 = vector.broadcast %cst_61 : f32 to vector<1x64xf32>
    %c0_i32_62 = arith.constant 0 : i32
    %119 = vector.broadcast %c0_i32_62 : i32 to vector<48x64xi32>
    %120 = arith.cmpi eq, %117, %119 : vector<48x64xi32>
    %121 = vector.extract_strided_slice %115 {offsets = [0, 0], sizes = [47, 64], strides = [1, 1]} : vector<48x64xf32> to vector<47x64xf32>
    %122 = tpu.concatenate %118, %121 in 0 : vector<1x64xf32>, vector<47x64xf32> -> vector<48x64xf32>
    %cst_63 = arith.constant 0.000000e+00 : f32
    %123 = vector.broadcast %cst_63 : f32 to vector<48x64xf32>
    %124 = arith.select %120, %123, %122 : vector<48x64xi1>, vector<48x64xf32>
    %c7_i32_64 = arith.constant 7 : i32
    %125 = vector.broadcast %c7_i32_64 : i32 to vector<48x64xi32>
    %126 = arith.cmpi eq, %117, %125 : vector<48x64xi32>
    %127 = vector.extract_strided_slice %115 {offsets = [1, 0], sizes = [47, 64], strides = [1, 1]} : vector<48x64xf32> to vector<47x64xf32>
    %128 = tpu.concatenate %127, %118 in 0 : vector<47x64xf32>, vector<1x64xf32> -> vector<48x64xf32>
    %cst_65 = arith.constant 0.000000e+00 : f32
    %129 = vector.broadcast %cst_65 : f32 to vector<48x64xf32>
    %130 = arith.select %126, %129, %128 : vector<48x64xi1>, vector<48x64xf32>
    %131 = vector.extract_strided_slice %124 {offsets = [0, 0], sizes = [32, 64], strides = [1, 1]} : vector<48x64xf32> to vector<32x64xf32>
    %132 = vector.extract_strided_slice %115 {offsets = [0, 0], sizes = [32, 64], strides = [1, 1]} : vector<48x64xf32> to vector<32x64xf32>
    %133 = vector.extract_strided_slice %130 {offsets = [0, 0], sizes = [32, 64], strides = [1, 1]} : vector<48x64xf32> to vector<32x64xf32>
    %134 = vector.extract_strided_slice %124 {offsets = [8, 0], sizes = [32, 64], strides = [1, 1]} : vector<48x64xf32> to vector<32x64xf32>
    %135 = vector.extract_strided_slice %115 {offsets = [8, 0], sizes = [32, 64], strides = [1, 1]} : vector<48x64xf32> to vector<32x64xf32>
    %136 = vector.extract_strided_slice %130 {offsets = [8, 0], sizes = [32, 64], strides = [1, 1]} : vector<48x64xf32> to vector<32x64xf32>
    %137 = vector.extract_strided_slice %124 {offsets = [16, 0], sizes = [32, 64], strides = [1, 1]} : vector<48x64xf32> to vector<32x64xf32>
    %138 = vector.extract_strided_slice %115 {offsets = [16, 0], sizes = [32, 64], strides = [1, 1]} : vector<48x64xf32> to vector<32x64xf32>
    %139 = vector.extract_strided_slice %130 {offsets = [16, 0], sizes = [32, 64], strides = [1, 1]} : vector<48x64xf32> to vector<32x64xf32>
    %140 = tpu.concatenate %131, %132, %133, %134, %135, %136, %137, %138, %139 in 1 : vector<32x64xf32>, vector<32x64xf32>, vector<32x64xf32>, vector<32x64xf32>, vector<32x64xf32>, vector<32x64xf32>, vector<32x64xf32>, vector<32x64xf32>, vector<32x64xf32> -> vector<32x576xf32>
    %141 = arith.truncf %140 : vector<32x576xf32> to vector<32x576xbf16>
    %c0_66 = arith.constant 0 : index
    %c0_67 = arith.constant 0 : index
    %142 = vector.load %arg8[%c0_66, %c0_67] : memref<576x128xbf16, #tpu.memory_space<vmem>>, vector<576x128xbf16>
    %cst_68 = arith.constant dense<0.000000e+00> : vector<32x128xf32>
    %143 = tpu.matmul %141, %142, %cst_68 {dimension_numbers = #tpu.dot_dimension_numbers<[1], [0], [0], [1], [0, 0, 1, 1], [], []>} : vector<32x576xbf16>, vector<576x128xbf16>, vector<32x128xf32> -> vector<32x128xf32>
    %c0_69 = arith.constant 0 : index
    %c0_70 = arith.constant 0 : index
    %144 = vector.load %arg9[%c0_69, %c0_70] : memref<1x128xf32, #tpu.memory_space<vmem>>, vector<1x128xf32>
    %145 = vector.broadcast %144 : vector<1x128xf32> to vector<32x128xf32>
    %146 = arith.mulf %143, %145 : vector<32x128xf32>
    %c0_71 = arith.constant 0 : index
    %c0_72 = arith.constant 0 : index
    %147 = vector.load %arg10[%c0_71, %c0_72] : memref<1x128xf32, #tpu.memory_space<vmem>>, vector<1x128xf32>
    %148 = vector.broadcast %147 : vector<1x128xf32> to vector<32x128xf32>
    %149 = arith.addf %146, %148 : vector<32x128xf32>
    %cst_73 = arith.constant 0.000000e+00 : f32
    %150 = vector.broadcast %cst_73 : f32 to vector<32x128xf32>
    %151 = arith.maximumf %149, %150 : vector<32x128xf32>
    %152 = vector.shape_cast %151 : vector<32x128xf32> to vector<2x2x8x128xf32>
    %153 = vector.extract_strided_slice %152 {offsets = [0, 0, 0, 0], sizes = [2, 1, 8, 128], strides = [1, 1, 1, 1]} : vector<2x2x8x128xf32> to vector<2x1x8x128xf32>
    %154 = vector.shape_cast %153 : vector<2x1x8x128xf32> to vector<2x8x128xf32>
    %155 = vector.extract_strided_slice %152 {offsets = [0, 1, 0, 0], sizes = [2, 1, 8, 128], strides = [1, 1, 1, 1]} : vector<2x2x8x128xf32> to vector<2x1x8x128xf32>
    %156 = vector.shape_cast %155 : vector<2x1x8x128xf32> to vector<2x8x128xf32>
    %157 = arith.maximumf %154, %156 : vector<2x8x128xf32>
    %c0_74 = arith.constant 0 : index
    %c0_75 = arith.constant 0 : index
    %c0_76 = arith.constant 0 : index
    %c0_77 = arith.constant 0 : index
    %158 = vector.load %arg11[%c0_74, %c0_75, %c0_76, %c0_77] : memref<1x2x8x128xf32, #tpu.memory_space<vmem>>, vector<1x2x8x128xf32>
    %159 = vector.shape_cast %158 : vector<1x2x8x128xf32> to vector<2x8x128xf32>
    %160 = vector.shape_cast %157 : vector<2x8x128xf32> to vector<1x2x8x128xf32>
    tpu.vector_store %arg11[%c0_74, %c0_75, %c0_76, %c0_77], %160 {strides = array<i32>} : memref<1x2x8x128xf32, #tpu.memory_space<vmem>>, vector<1x2x8x128xf32>,
    return
  }
  func.func @transform_0(%arg0: i32) -> (i32, i32, i32, i32) {
    %c0_i32 = arith.constant 0 : i32
    %c0_i32_0 = arith.constant 0 : i32
    %c0_i32_1 = arith.constant 0 : i32
    %c0_i32_2 = arith.constant 0 : i32
    return %arg0, %c0_i32, %c0_i32_0, %c0_i32_1 : i32, i32, i32, i32
  }
  func.func @transform_1(%arg0: i32) -> (i32, i32) {
    %c0_i32 = arith.constant 0 : i32
    %c0_i32_0 = arith.constant 0 : i32
    %c0_i32_1 = arith.constant 0 : i32
    return %c0_i32, %c0_i32_0 : i32, i32
  }
  func.func @transform_2(%arg0: i32) -> (i32, i32) {
    %c0_i32 = arith.constant 0 : i32
    %c0_i32_0 = arith.constant 0 : i32
    %c0_i32_1 = arith.constant 0 : i32
    return %c0_i32, %c0_i32_0 : i32, i32
  }
  func.func @transform_3(%arg0: i32) -> (i32, i32) {
    %c0_i32 = arith.constant 0 : i32
    %c0_i32_0 = arith.constant 0 : i32
    %c0_i32_1 = arith.constant 0 : i32
    return %c0_i32, %c0_i32_0 : i32, i32
  }
  func.func @transform_4(%arg0: i32) -> (i32, i32) {
    %c0_i32 = arith.constant 0 : i32
    %c0_i32_0 = arith.constant 0 : i32
    %c0_i32_1 = arith.constant 0 : i32
    return %c0_i32, %c0_i32_0 : i32, i32
  }
  func.func @transform_5(%arg0: i32) -> (i32, i32) {
    %c0_i32 = arith.constant 0 : i32
    %c0_i32_0 = arith.constant 0 : i32
    %c0_i32_1 = arith.constant 0 : i32
    return %c0_i32, %c0_i32_0 : i32, i32
  }
  func.func @transform_6(%arg0: i32) -> (i32, i32) {
    %c0_i32 = arith.constant 0 : i32
    %c0_i32_0 = arith.constant 0 : i32
    %c0_i32_1 = arith.constant 0 : i32
    return %c0_i32, %c0_i32_0 : i32, i32
  }
  func.func @transform_7(%arg0: i32) -> (i32, i32) {
    %c0_i32 = arith.constant 0 : i32
    %c0_i32_0 = arith.constant 0 : i32
    %c0_i32_1 = arith.constant 0 : i32
    return %c0_i32, %c0_i32_0 : i32, i32
  }
  func.func @transform_8(%arg0: i32) -> (i32, i32) {
    %c0_i32 = arith.constant 0 : i32
    %c0_i32_0 = arith.constant 0 : i32
    %c0_i32_1 = arith.constant 0 : i32
    return %c0_i32, %c0_i32_0 : i32, i32
  }
  func.func @transform_9(%arg0: i32) -> (i32, i32) {
    %c0_i32 = arith.constant 0 : i32
    %c0_i32_0 = arith.constant 0 : i32
    %c0_i32_1 = arith.constant 0 : i32
    return %c0_i32, %c0_i32_0 : i32, i32
  }
  func.func @transform_10(%arg0: i32) -> (i32, i32, i32, i32) {
    %c0_i32 = arith.constant 0 : i32
    %c0_i32_0 = arith.constant 0 : i32
    %c0_i32_1 = arith.constant 0 : i32
    %c0_i32_2 = arith.constant 0 : i32
    return %arg0, %c0_i32, %c0_i32_0, %c0_i32_1 : i32, i32, i32, i32
  }
}

</mosaic_0001>

<bundles_post_ra>
// kernel: tpu_custom_call.1
= control target key start
LH: loop header
LB: loop body
LE: loop exit
PB: predicated region body
PF: predicated region fallthrough
CT: control target
= control target key end

     0   :  { %15 = vsyncpa [#allocation6], 0  ;;  %s5317_s0 = inlined_call_operand.hbm [shape: f32[2,16,8,16], index: 0, kind: input, shape index: {}]   ;;  %s5318_s1 = inlined_call_operand.vmem [shape: bf16[144,48], index: 1, kind: input, shape index: {}]   ;;  %s5319_s2 = inlined_call_operand.vmem [shape: f32[1,48], index: 2, kind: input, shape index: {}]   ;;  %s5320_s3 = inlined_call_operand.vmem [shape: f32[1,48], index: 3, kind: input, shape index: {}]   ;;  %s5321_s4 = inlined_call_operand.vmem [shape: bf16[432,64], index: 4, kind: input, shape index: {}]   ;;  %s5322_s5 = inlined_call_operand.vmem [shape: f32[1,64], index: 5, kind: input, shape index: {}]   ;;  %s5323_s6 = inlined_call_operand.vmem [shape: f32[1,64], index: 6, kind: input, shape index: {}]   ;;  %s5324_s7 = inlined_call_operand.vmem [shape: bf16[576,128], index: 7, kind: input, shape index: {}]   ;;  %s5325_s8 = inlined_call_operand.vmem [shape: f32[1,128], index: 8, kind: input, shape index: {}]   ;;  %s5326_s9 = inlined_call_operand.vmem [shape: f32[1,128], index: 9, kind: input, shape index: {}]   ;;  %s5327_s10 = inlined_call_operand.hbm [shape: f32[2,2,8,128], index: 10, kind: output, shape index: {}]  }
   0x1   :  { %17 = vsyncpa [#allocation6 + $0x1], 0 }
   0x2   :  { %18 = vsyncpa [#allocation7], 0 }
   0x3   :  { %20 = vsyncpa [#allocation7 + $0x1], 0  ;;  %s3810_s13 = smov 0   ;;  %s3812_s14 = smov 0  }
   0x4   :  { %s3814_s15 = smov 0   ;;  %s3816_s16 = smov 0  }
   0x5 LB: > { %5333 = sst [smem:[#allocation11_spill]] %s3734_s15  ;;  %s3831_s17 = sadd.s32 4294967295, %s3738_s16   ;;  %s3738_s16 = sphi %s3816_s16, %s5345_s16   ;;  %s3734_s15 = sphi %s3814_s15, %s5347_s15   ;;  %s3730_s14 = sphi %s3812_s14, %s5349_s14   ;;  %s3726_s13 = sphi %s3810_s13, %s5348_s13  }
   0x6   : > { %s2838_s18 = sadd.s32 4294967294, %s3738_s16   ;;  %s3835_s19 = sadd.s32 1, %s3738_s16  }
   0x7   : > { %5334 = sst [smem:[#allocation12_spill]] %s3835_s19  ;;  %s33_s20 = sadd.s32 1, %s3734_s15 }
   0x8   : > { %s30_s21 = ssub.s32 %s3738_s16, %s3835_s19  ;;  %p40_p0 = scmp.ne.s32.totalorder %s3734_s15, %s3730_s14 }
   0x9   : > { %p31_p1 = scmp.eq.s32.totalorder %s30_s21, 0  ;;  %p41_p2 = scmp.eq.s32.totalorder %s3738_s16, 0 }
   0xa   : > { %p46_p3 = scmp.ne.s32.totalorder %s3730_s14, %s3726_s13  ;;  %p47_p4 = scmp.eq.s32.totalorder %s3831_s17, 0 }
   0xb   : > { %s3847_s22 = scalar_select %p31_p1, %s3734_s15, %s33_s20  }
   0xc   : > { %p3849_p5 = por %p41_p2, %p40_p0  ;;  %p3853_p6 = por %p47_p4, %p46_p3 }
   0xd   : > { %5335 = sst [smem:[#allocation13_spill]] %s3847_s22  ;;  %p259_p7 = scmp.eq.s32.totalorder %s3831_s17, 1 }
   0xe   : > { %s5337_s24 = scalar_select %p3853_p6, 1, 0 }
   0xf   : > { %p265_p8 = scmp.eq.s32.totalorder %s2838_s18, 1  ;;  %p3072_p10 = scmp.lt.s32.totalorder %s3738_s16, 2 }
  0x10   : > { %p3860_p11 = por %p259_p7, %p40_p0  ;;  %s312_s27 = sand.u32 1, %s3734_s15  }
  0x11   : > { %p3864_p12 = por %p265_p8, %p46_p3  ;;  %s2944_s28 = sshll.u32 %s3738_s16, 11 }
  0x12   : > { %s5338_s25 = scalar_select %p3860_p11, 1, 0 }
  0x13   : > { %s5339_s26 = scalar_select %p3864_p12, 1, 0 }
  0x14   : > { %s2841_s29 = sshll.u32 %s312_s27, 7  ;;  %s3873_s12 = scalar_lea.hbm %s5317_s0, %s2944_s28 }
  0x15   : > { %s316_s18 = scalar_lea.vmem [#allocation5], %s2841_s29  ;;  %p3877_p13 = pnand %p3072_p10, %p3849_p5 }
  0x16   : > { %s323_s20 = sshll.u32 %s316_s18, 4  ;;  %s3883_s22 = scalar_lea.sflag [#allocation6], %s312_s27  ;;  %s3881_s20 = int_to_ptr.vmem [resolvable:$true] %s323_s20 }
  0x17   : > { %s3646_s15 = scalar_lea.hbm %s3873_s12, 2048  ;;  %p3648_p1 = pneg %p3877_p13 }
  0x18   : > { %p3647_p0 = scmp.ne.s32.totalorder %s3873_s12, %s3646_s15  ;;  %s3651_s29 = scalar_lea.hbm %s5317_s0, 4096 }
  0x19   : > { %p3652_p4 = scmp.lt.s32.totalorder %s3873_s12, %s5317_s0  ;;  %p3653_p5 = scmp.lt.s32.totalorder %s3651_s29, %s3646_s15 }
  0x1a   : > { %p3649_p2 = pnand %p3648_p1, %p3647_p0 }
  0x1b   : > { %p3654_p7 = por %p3653_p5, %p3652_p4 }
  0x1c   : > { %p3650_p3 = pneg %p3649_p2 }
  0x1e   : > { %p3655_p8 = pnand %p3654_p7, %p3650_p3 }
  0x20   : > { %3658 = shalt.err (!%p3655_p8)
}
  0x21   : > { %s3659_s27 = scalar_lea.vmem %s3881_s20, 2048  ;;  %s3740_s18 = smov [#allocation5]  }
  0x22   : > { %p3660_p10 = scmp.ne.s32.totalorder %s3881_s20, %s3659_s27  ;;  %s3664_s19 = sshll.u32 %s3740_s18, 4  ;;  %s3665_s19 = int_to_ptr.vmem [resolvable:$false] %s3664_s19 }
  0x23   : > { %s3666_s28 = scalar_lea.vmem %s3665_s19, 4096  ;;  %p3667_p2 = scmp.lt.s32.totalorder %s3881_s20, %s3665_s19 }
  0x24   : > { %p3662_p9 = pnand %p3660_p10, %p3648_p1  ;;  %p3668_p12 = scmp.lt.s32.totalorder %s3666_s28, %s3659_s27 }
  0x26   : > { %p3663_p0 = pneg %p3662_p9  ;;  %p3669_p11 = por %p3668_p12, %p3667_p2 }
  0x28   : > { %p3670_p6 = pnand %p3669_p11, %p3663_p0 }
  0x2a   : > { %3673 = shalt.err (!%p3670_p6)
}
  0x2b   : > { %s3741_s15 = smov 128   ;;  %s3742_s30 = smov 8  }
  0x2c   : > { %3067 = dma.hbm_to_vmem [thread:$0]  (!%p3877_p13), %s3873_s12, 2048, %s3881_s20, %s3883_s22, %s3741_s15, %s3741_s15, %s3742_s30  }
  0x2d   : > { %p2844_p9 = scmp.ge.s32.totalorder %s3738_s16, 1  ;;  %p331_p1 = scmp.lt.s32.totalorder %s3738_s16, 3 }
  0x2f   : > { %p332_p3 = pnand %p2844_p9, %p331_p1 }
  0x30   : > { %s3907_s19 = sand.u32 (!%p332_p3), 1, %s3730_s14   ;;  %p5341_p6 = scmp.ne.s32.totalorder (!%p332_p3), %s5337_s24, 0 }
  0x31   : > { %335 = sbr.rel (%p332_p3) target bundleno = 1245 (0x4dd), region = 60  ;;  %s2845_s29 = sshll.u32 (!%p332_p3), %s3907_s19, 7 }
  0x32   : > { %s338_s23 = scalar_lea.sflag (!%p332_p3), [#allocation6], %s3907_s19  ;;  %s3911_s11 = scalar_lea.vmem (!%p332_p3), [#allocation5], %s2845_s29 }
  0x36   : > { %3717 = dma.done.wait (%p5341_p6), %s338_s23, 2048  }
  0x37   : > { %3719 = vsyncadd (%p5341_p6), %s338_s23, 4294965248  ;;  %vm379_vm0 = vcmask 130048   ;;  %v3743_v0 = vmov 0.0   ;;  %v3744_v1 = vmov 0   ;;  %v391_v2 = vld [vmem:[%s3911_s11] sm:$0xff]  ;;  %v392_v3 = vld [vmem:[%s3911_s11 + $0x8] sm:$0xff]  ;;  %v442_v5 = vlaneseq }
  0x38   : > { %380 = vst.msk [vmem:[#allocation2] sm:$0xff] %vm379_vm0, %v3743_v0  ;;  %382 = vst.msk [vmem:[#allocation2 + $0x88] sm:$0xff] %vm379_vm0, %v3743_v0  ;;  %1208 = vmatprep.subr.bf16.mxu0 %v3744_v1  ;;  %v393_v4 = vld [vmem:[%s3911_s11 + $0x10] sm:$0xff]  ;;  %v394_v6 = vld [vmem:[%s3911_s11 + $0x18] sm:$0xff]  ;;  %vm463_vm1 = vcmask 1040384   ;;  %vm383_vm2 = vcmask 392192  }
  0x39   : > { %408 = vst.msk [vmem:[#allocation2 + $0x8] sm:$0xff] %vm379_vm0, %v391_v2  ;;  %409 = vst.msk [vmem:[#allocation2 + $0x10] sm:$0xff] %vm379_vm0, %v392_v3  ;;  %v395_v7 = vld [vmem:[%s3911_s11 + $0x20] sm:$0xff]  ;;  %v396_v8 = vld [vmem:[%s3911_s11 + $0x28] sm:$0xff]  ;;  %v3941_v14 = vshrl.u32 %v442_v5, 7  ;;  %vm537_vm4 = vcmask 1046528  }
  0x3a   : > { %410 = vst.msk [vmem:[#allocation2 + $0x18] sm:$0xff] %vm379_vm0, %v393_v4  ;;  %411 = vst.msk [vmem:[#allocation2 + $0x20] sm:$0xff] %vm379_vm0, %v394_v6  ;;  %v397_v9 = vld [vmem:[%s3911_s11 + $0x30] sm:$0xff]  ;;  %v398_v10 = vld [vmem:[%s3911_s11 + $0x38] sm:$0xff]  ;;  %s3745_s21 = smov 16   ;;  %s3746_s27 = smov 64  }
  0x3b   : > { %412 = vst.msk [vmem:[#allocation2 + $0x28] sm:$0xff] %vm379_vm0, %v395_v7  ;;  %413 = vst.msk [vmem:[#allocation2 + $0x30] sm:$0xff] %vm379_vm0, %v396_v8  ;;  %v399_v11 = vld [vmem:[%s3911_s11 + $0x40] sm:$0xff]  ;;  %v400_v12 = vld [vmem:[%s3911_s11 + $0x48] sm:$0xff]  ;;  %vm444_vm3 = vcmp.eq.s32.totalorder %v3941_v14, 0  ;;  %vm536_vm5 = vcmp.eq.s32.totalorder %v3941_v14, 7 }
  0x3c   : > { %414 = vst.msk [vmem:[#allocation2 + $0x38] sm:$0xff] %vm379_vm0, %v397_v9  ;;  %415 = vst.msk [vmem:[#allocation2 + $0x40] sm:$0xff] %vm379_vm0, %v398_v10  ;;  %v401_v13 = vld [vmem:[%s3911_s11 + $0x50] sm:$0xff]  ;;  %v402_v15 = vld [vmem:[%s3911_s11 + $0x58] sm:$0xff]  ;;  %s3747_s15 = smov 112   ;;  %s3748_s23 = smov 48  }
  0x3d   : > { %416 = vst.msk [vmem:[#allocation2 + $0x48] sm:$0xff] %vm379_vm0, %v399_v11  ;;  %417 = vst.msk [vmem:[#allocation2 + $0x50] sm:$0xff] %vm379_vm0, %v400_v12  ;;  %v403_v16 = vld [vmem:[%s3911_s11 + $0x60] sm:$0xff]  ;;  %v404_v17 = vld [vmem:[%s3911_s11 + $0x68] sm:$0xff]  ;;  %s3749_s20 = smov 32   ;;  %s3750_s18 = smov 96  }
  0x3e   : > { %418 = vst.msk [vmem:[#allocation2 + $0x58] sm:$0xff] %vm379_vm0, %v401_v13  ;;  %419 = vst.msk [vmem:[#allocation2 + $0x60] sm:$0xff] %vm379_vm0, %v402_v15  ;;  %v405_v18 = vld [vmem:[%s3911_s11 + $0x70] sm:$0xff]  ;;  %v406_v19 = vld [vmem:[%s3911_s11 + $0x78] sm:$0xff]  ;;  %s3751_s28 = smov 80   ;;  %vm387_vm6 = vcmask 523264  }
  0x3f   : > { %420 = vst.msk [vmem:[#allocation2 + $0x68] sm:$0xff] %vm379_vm0, %v403_v16  ;;  %421 = vst.msk [vmem:[#allocation2 + $0x70] sm:$0xff] %vm379_vm0, %v404_v17  ;;  %v3954_v20 = vld [vmem:[#allocation2] sm:$0xff]  ;;  %v3574_v21 = vld [vmem:[%s5318_s1 + $0x38] sm:$0xff]   ;;  %vm996_vm7 = vcmask 261120   ;;  %vm1045_vm8 = vcmask 654336  }
  0x40   : > { %422 = vst.msk [vmem:[#allocation2 + $0x78] sm:$0xff] %vm379_vm0, %v405_v18  ;;  %423 = vst.msk [vmem:[#allocation2 + $0x80] sm:$0xff] %vm379_vm0, %v406_v19  ;;  %v464_v22 = vrot.slane %v3954_v20, 7  ;;  %v3575_v23 = vld [vmem:[%s5318_s1 + $0x30] sm:$0xff]   ;;  %v425_v24 = vld [vmem:[#allocation2 + $0x8] sm:$0xff]  ;;  %v538_v25 = vrot.slane %v3954_v20, 1  ;;  %1209 = vmatpush1.bf16.msra.mxu0 %v3574_v21 }
  0x41   : > { %384 = vst.msk [vmem:[#allocation3] sm:$0xff] %vm383_vm2, %v3743_v0  ;;  %386 = vst.msk [vmem:[#allocation3 + $0x48] sm:$0xff] %vm383_vm2, %v3743_v0  ;;  %v426_v26 = vld [vmem:[#allocation2 + $0x10] sm:$0xff]  ;;  %v427_v27 = vld [vmem:[#allocation2 + $0x18] sm:$0xff]  ;;  %v465_v28 = vrot.slane %v425_v24, 7  ;;  %v539_v29 = vrot.slane %v425_v24, 1  ;;  %v3119_v30 = vpack.i.bf16 %v425_v24, %v3954_v20  ;;  %1210 = vmatprep.subr.bf16.mxu0 %v3744_v1 }
  0x42   : > { %v3124_v31 = vpack.i.bf16 %v426_v26, %v425_v24  ;;  %v3129_v32 = vpack.i.bf16 %v427_v27, %v426_v26  ;;  %v467_v33 = vrot.slane %v426_v26, 7  ;;  %v541_v35 = vrot.slane %v426_v26, 1  ;;  %v3979_v37 = vld [vmem:[#allocation2 + $0x20] sm:$0xff]  ;;  %v3995_v46 = vld [vmem:[#allocation2 + $0x28] sm:$0xff]  ;;  %v3578_v62 = vld [vmem:[%s5318_s1 + $0x18] sm:$0xff]   ;;  %388 = vst.msk [vmem:[#allocation4] sm:$0xff] %vm387_vm6, %v3743_v0 }
  0x43   : > { %3120 = vrot.lane.b32.xlu0 %v3119_v30, %s3745_s21  ;;  %v466_v34 = vsel %vm463_vm1, %v464_v22, %v465_v28  ;;  %v469_v36 = vrot.slane %v427_v27, 7  ;;  %v540_v40 = vsel %vm537_vm4, %v538_v25, %v539_v29  ;;  %v543_v41 = vrot.slane %v427_v27, 1  ;;  %v3576_v47 = vld [vmem:[%s5318_s1 + $0x28] sm:$0xff]   ;;  %v3577_v54 = vld [vmem:[%s5318_s1 + $0x20] sm:$0xff]   ;;  %v4039_v4 = vld [vmem:[#allocation2 + $0x30] sm:$0xff]  ;;  %390 = vst.msk [vmem:[#allocation4 + $0x28] sm:$0xff] %vm387_vm6, %v3743_v0 }
  0x44   : > { %3125 = vrot.lane.b32.xlu1 %v3124_v31, %s3746_s27  ;;  %v468_v38 = vsel %vm463_vm1, %v465_v28, %v467_v33  ;;  %v3984_v39 = vsel %vm444_vm3, 0.0, %v466_v34  ;;  %1211 = vmatpush1.bf16.msra.mxu0 %v3575_v23  ;;  %v542_v43 = vsel %vm537_vm4, %v539_v29, %v541_v35  ;;  %v471_v45 = vrot.slane %v3979_v37, 7  ;;  %v3579_v5 = vld [vmem:[%s5318_s1 + $0x10] sm:$0xff]   ;;  %v3580_v16 = vld [vmem:[%s5318_s1 + $0x8] sm:$0xff]   ;;  %v4077_v19 = vld [vmem:[#allocation2 + $0x38] sm:$0xff]  ;;  %s2945_s30 = sshll.u32 %s3831_s17, 8 }
  0x45   : > { %v3989_v42 = vsel %vm444_vm3, 0.0, %v468_v38  ;;  %v470_v44 = vsel %vm463_vm1, %v467_v33, %v469_v36  ;;  %1212 = vmatprep.subr.bf16.mxu0 %v3744_v1  ;;  %v3139_v48 = vpack.i.bf16 %v3979_v37, %v427_v27  ;;  %v592_v50 = vsel %vm536_vm5, 0.0, %v540_v40  ;;  %v3581_v25 = vld [vmem:[%s5318_s1] sm:$0xff]   ;;  %v4102_v31 = vld [vmem:[#allocation2 + $0x88] sm:$0xff]  ;;  %s5272_s24 = scalar_lea.hbm %s5327_s10, %s2945_s30  ;;  %s2752_s17 = scalar_lea.sflag [#allocation7], %s3907_s19 }
  0x46   : > { %v3149_v49 = vpack.i.bf16 %v3989_v42, %v3984_v39  ;;  %v593_v51 = vsel %vm536_vm5, 0.0, %v542_v43  ;;  %v4011_v52 = vsel %vm444_vm3, 0.0, %v470_v44  ;;  %v544_v53 = vsel %vm537_vm4, %v541_v35, %v543_v41  ;;  %v4100_v30 = vld [vmem:[#allocation2 + $0x40] sm:$0xff]  ;;  %v4124_v43 = vld [vmem:[#allocation2 + $0x50] sm:$0xff]  ;;  %p5342_p12 = scmp.ne.s32.totalorder %s5338_s25, 0 }
  0x47   : > { %3130 = vrot.lane.b32.xlu0 %v3129_v32, %s3747_s15  ;;  %v472_v55 = vsel %vm463_vm1, %v469_v36, %v471_v45  ;;  %v545_v56 = vrot.slane %v3979_v37, 1  ;;  %v547_v57 = vrot.slane %v3995_v46, 1  ;;  %v3144_v58 = vpack.i.bf16 %v593_v51, %v592_v50  ;;  %v3582_v33 = vld [vmem:[%s5318_s1 + $0x40] sm:$0xff]   ;;  %v4114_v36 = vld [vmem:[#allocation2 + $0x48] sm:$0xff] }
  0x48   : > { %3135 = vrot.lane.b32.xlu1 %v3129_v32, %s3745_s21  ;;  %1213 = vmatpush1.bf16.msra.mxu0 %v3576_v47  ;;  %v3159_v59 = vpack.i.bf16 %v4011_v52, %v3989_v42  ;;  %v4027_v60 = vsel %vm536_vm5, 0.0, %v544_v53  ;;  %v4031_v61 = vsel %vm444_vm3, 0.0, %v472_v55  ;;  %v473_v3 = vrot.slane %v3995_v46, 7  ;;  %v4126_v44 = vld [vmem:[#allocation2 + $0x80] sm:$0xff] }
  0x49   : > { %1214 = vmatprep.subr.bf16.mxu0 %v3744_v1  ;;  %v546_v63 = vsel %vm537_vm4, %v543_v41, %v545_v56  ;;  %v548_v2 = vsel %vm537_vm4, %v545_v56, %v547_v57  ;;  %v3154_v6 = vpack.i.bf16 %v4027_v60, %v593_v51  ;;  %v3169_v7 = vpack.i.bf16 %v4031_v61, %v4011_v52 }
  0x4a   : > { %v4052_v8 = vsel %vm536_vm5, 0.0, %v546_v63  ;;  %v4056_v9 = vsel %vm536_vm5, 0.0, %v548_v2  ;;  %v474_v10 = vsel %vm463_vm1, %v471_v45, %v473_v3  ;;  %v549_v11 = vrot.slane %v4039_v4, 1 }
  0x4b   : > { %3140 = vrot.lane.b32.xlu0 %v3139_v48, %s3746_s27  ;;  %v3164_v12 = vpack.i.bf16 %v4052_v8, %v4027_v60  ;;  %v3174_v13 = vpack.i.bf16 %v4056_v9, %v4052_v8  ;;  %v4069_v15 = vsel %vm444_vm3, 0.0, %v474_v10  ;;  %v475_v18 = vrot.slane %v4039_v4, 7 }
  0x4c   : > { %3150 = vrot.lane.b32.xlu1 %v3149_v49, %s3748_s23  ;;  %1215 = vmatpush1.bf16.msra.mxu0 %v3577_v54  ;;  %v550_v17 = vsel %vm537_vm4, %v547_v57, %v549_v11  ;;  %v3179_v21 = vpack.i.bf16 %v4069_v15, %v4031_v61  ;;  %v3184_v23 = vpack.i.bf16 %v3995_v46, %v3979_v37  ;;  %v551_v27 = vrot.slane %v4077_v19, 1 }
  0x4d   : > { %1216 = vmatprep.subr.bf16.mxu0 %v3744_v1  ;;  %v4087_v24 = vsel %vm536_vm5, 0.0, %v550_v17  ;;  %v476_v26 = vsel %vm463_vm1, %v473_v3, %v475_v18  ;;  %v477_v28 = vrot.slane %v4077_v19, 7  ;;  %v571_v37 = vrot.slane %v4102_v31, 1 }
  0x4e   : > { %v3194_v29 = vpack.i.bf16 %v4087_v24, %v4056_v9  ;;  %v4106_v32 = vsel %vm444_vm3, 0.0, %v476_v26  ;;  %v552_v34 = vsel %vm537_vm4, %v549_v11, %v551_v27  ;;  %v3204_v40 = vpack.i.bf16 %v4039_v4, %v3995_v46 }
  0x4f   : > { %3145 = vrot.lane.b32.xlu0 %v3144_v58, %s3749_s20  ;;  %v478_v35 = vsel %vm463_vm1, %v475_v18, %v477_v28  ;;  %v3199_v38 = vpack.i.bf16 %v4106_v32, %v4069_v15  ;;  %v553_v41 = vrot.slane %v4100_v30, 1  ;;  %v4130_v45 = vsel %vm536_vm5, 0.0, %v552_v34 }
  0x50   : > { %3160 = vrot.lane.b32.xlu1 %v3159_v59, %s3750_s18  ;;  %1217 = vmatpush1.bf16.msra.mxu0 %v3578_v62  ;;  %v4134_v47 = vsel %vm444_vm3, 0.0, %v478_v35  ;;  %v479_v48 = vrot.slane %v4100_v30, 7  ;;  %v555_v49 = vrot.slane %v4114_v36, 1  ;;  %v481_v46 = vrot.slane %v4114_v36, 7 }
  0x51   : > { %1218 = vmatprep.subr.bf16.mxu0 %v3744_v1  ;;  %v569_v50 = vrot.slane %v4126_v44, 1  ;;  %v3209_v51 = vpack.i.bf16 %v4130_v45, %v4087_v24  ;;  %v3214_v53 = vpack.i.bf16 %v4134_v47, %v4106_v32  ;;  %v557_v54 = vrot.slane %v4124_v43, 1 }
  0x52   : > { %v554_v56 = vsel %vm537_vm4, %v551_v27, %v553_v41  ;;  %v480_v57 = vsel %vm463_vm1, %v477_v28, %v479_v48  ;;  %v591_v58 = vsel %vm537_vm4, %v571_v37, 0.0  ;;  %v556_v59 = vsel %vm537_vm4, %v553_v41, %v555_v49 }
  0x53   : > { %3155 = vrot.lane.b32.xlu0 %v3154_v6, %s3751_s28  ;;  %v572_v55 = vsel %vm537_vm4, %v569_v50, %v571_v37  ;;  %v482_v62 = vsel %vm463_vm1, %v479_v48, %v481_v46  ;;  %v4161_v2 = vsel %vm536_vm5, 0.0, %v591_v58  ;;  %v3219_v3 = vpack.i.bf16 %v4077_v19, %v4039_v4 }
  0x54   : > { %3170 = vrot.lane.b32.xlu1 %v3169_v7, %s3748_s23  ;;  %1219 = vmatpush1.bf16.msra.mxu0 %v3579_v5  ;;  %v4157_v63 = vsel %vm536_vm5, 0.0, %v572_v55  ;;  %v4171_v6 = vsel %vm536_vm5, 0.0, %v554_v56  ;;  %v4175_v7 = vsel %vm444_vm3, 0.0, %v480_v57  ;;  %v558_v10 = vsel %vm537_vm4, %v555_v49, %v557_v54  ;;  %v437_v49 = vld [vmem:[#allocation2 + $0x68] sm:$0xff] }
  0x55   : > { %1220 = vmatprep.subr.bf16.mxu0 %v3744_v1  ;;  %v1111_v5 = vpack.c.bf16 %v4161_v2, %v4157_v63  ;;  %v1097_v4 = vpack.c.bf16 %v4052_v8, %v4027_v60  ;;  %v4186_v11 = vsel %vm536_vm5, 0.0, %v556_v59  ;;  %v1101_v0 = vpack.c.bf16 %v4171_v6, %v4130_v45 }
  0x56   : > { %v3229_v60 = vpack.i.bf16 %v4171_v6, %v4130_v45  ;;  %v3234_v8 = vpack.i.bf16 %v4175_v7, %v4134_v47  ;;  %v4207_v17 = vsel %vm536_vm5, 0.0, %v558_v10  ;;  %v483_v18 = vrot.slane %v4124_v43, 7 }
  0x57   : > { %3165 = vrot.lane.b32.xlu0 %v3164_v12, %s3749_s20  ;;  %v4190_v12 = vsel %vm444_vm3, 0.0, %v482_v62  ;;  %2856 = vmatprep.mubr.msk.bf16.mxu0 %vm379_vm0, %v1097_v4  ;;  %v3244_v26 = vpack.i.bf16 %v4186_v11, %v4171_v6  ;;  %v3254_v34 = vpack.i.bf16 %v4114_v36, %v4100_v30  ;;  %vm1062_vm9 = vcmask 785408  }
  0x58   : > { %3175 = vrot.lane.b32.xlu1 %v3174_v13, %s3751_s28  ;;  %1221 = vmatpush1.bf16.msra.mxu0 %v3580_v16  ;;  %v1099_v13 = vpack.c.bf16 %v4087_v24, %v4056_v9  ;;  %v4194_v16 = vld [vmem:[#allocation2 + $0x58] sm:$0xff]  ;;  %vm1079_vm10 = vcmask 916480  }
  0x59   : > { %1222 = vmatprep.subr.bf16.mxu0 %v3744_v1  ;;  %v559_v27 = vrot.slane %v4194_v16, 1  ;;  %v485_v28 = vrot.slane %v4194_v16, 7 }
  0x5b   : > { %3180 = vrot.lane.b32.xlu0 %v3179_v21, %s3750_s18  ;;  %v4210_v21 = vld [vmem:[#allocation2 + $0x60] sm:$0xff]  ;;  %v560_v37 = vsel %vm537_vm4, %v557_v54, %v559_v27 }
  0x5c   : > { %3185 = vrot.lane.b32.xlu1 %v3184_v23, %s3747_s15  ;;  %1223 = vmatpush1.bf16.msra.mxu0 %v3581_v25  ;;  %v3239_v25 = vpack.i.bf16 %v4100_v30, %v4077_v19  ;;  %v561_v35 = vrot.slane %v4210_v21, 1  ;;  %v4242_v30 = vsel %vm536_vm5, 0.0, %v560_v37  ;;  %v487_v55 = vrot.slane %v4210_v21, 7  ;;  %v439_v37 = vld [vmem:[#allocation2 + $0x78] sm:$0xff] }
  0x5d   : > { %1238 = vmatprep.subr.bf16.mxu0 %v3744_v1  ;;  %v3279_v57 = vpack.i.bf16 %v4242_v30, %v4207_v17 }
  0x5e   : > { %v562_v48 = vsel %vm537_vm4, %v559_v27, %v561_v35  ;;  %v488_v62 = vsel %vm463_vm1, %v485_v28, %v487_v55 }
  0x5f   : > { %3190 = vrot.lane.b32.xlu0 %v3184_v23, %s3745_s21  ;;  %v1103_v23 = vpack.c.bf16 %v4207_v17, %v4186_v11  ;;  %v4259_v54 = vsel %vm536_vm5, 0.0, %v562_v48  ;;  %v4278_v10 = vsel %vm444_vm3, 0.0, %v488_v62  ;;  %v567_v48 = vrot.slane %v439_v37, 1 }
  0x60   : > { %3195 = vrot.lane.b32.xlu1 %v3194_v29, %s3749_s20  ;;  %1239 = vmatpush2.bf16.msra.mxu0 %v3582_v33  ;;  %v484_v29 = vsel %vm463_vm1, %v481_v46, %v483_v18  ;;  %v3249_v33 = vpack.i.bf16 %v4190_v12, %v4175_v7  ;;  %v4249_v46 = vld [vmem:[#allocation2 + $0x70] sm:$0xff]  ;;  %v1105_v56 = vpack.c.bf16 %v4259_v54, %v4242_v30 }
  0x61   : > { %v4231_v19 = vsel %vm444_vm3, 0.0, %v484_v29  ;;  %v565_v59 = vrot.slane %v4249_v46, 1  ;;  %v3309_v29 = vpack.i.bf16 %v4210_v21, %v4194_v16  ;;  %v3344_v62 = vpack.i.bf16 %v4249_v46, %v437_v49 }
  0x63   : > { %3200 = vrot.lane.b32.xlu0 %v3199_v38, %s3748_s23  ;;  %v486_v38 = vsel %vm463_vm1, %v483_v18, %v485_v28  ;;  %v3299_v18 = vpack.i.bf16 %v4259_v54, %v4242_v30 }
  0x64   : > { %3205 = vrot.lane.b32.xlu1 %v3204_v40, %s3746_s27  ;;  %v3264_v40 = vpack.i.bf16 %v4207_v17, %v4186_v11  ;;  %v4246_v41 = vsel %vm444_vm3, 0.0, %v486_v38 }
  0x65   : > { %v3284_v58 = vpack.i.bf16 %v4246_v41, %v4231_v19 }
  0x67   : > { %3210 = vrot.lane.b32.xlu0 %v3209_v51, %s3751_s28  ;;  %v3269_v51 = vpack.i.bf16 %v4231_v19, %v4190_v12 }
  0x68   : > { %3215 = vrot.lane.b32.xlu1 %v3214_v53, %s3750_s18  ;;  %v3274_v53 = vpack.i.bf16 %v4124_v43, %v4114_v36  ;;  %v563_v36 = vrot.slane %v437_v49, 1 }
  0x6a   : > { %v564_v4 = vsel %vm537_vm4, %v561_v35, %v563_v36  ;;  %v491_v35 = vrot.slane %v4249_v46, 7 }
  0x6b   : > { %3220 = vrot.lane.b32.xlu0 %v3219_v3, %s3747_s15 }
  0x6c   : > { %3225 = vrot.lane.b32.xlu1 %v3219_v3, %s3745_s21  ;;  %v3289_v3 = vpack.i.bf16 %v4194_v16, %v4124_v43  ;;  %v4290_v43 = vsel %vm536_vm5, 0.0, %v564_v4  ;;  %v495_v4 = vrot.slane %v4126_v44, 7 }
  0x6f   : > { %3230 = vrot.lane.b32.xlu0 %v3229_v60, %s3749_s20  ;;  %v489_v60 = vrot.slane %v437_v49, 7 }
  0x70   : > { %3235 = vrot.lane.b32.xlu1 %v3234_v8, %s3748_s23  ;;  %v566_v8 = vsel %vm537_vm4, %v563_v36, %v565_v59 }
  0x71   : > { %v4295_v27 = vsel %vm536_vm5, 0.0, %v566_v8  ;;  %v492_v16 = vsel %vm463_vm1, %v489_v60, %v491_v35 }
  0x72   : > { %v1107_v28 = vpack.c.bf16 %v4295_v27, %v4290_v43 }
  0x73   : > { %3240 = vrot.lane.b32.xlu0 %v3239_v25, %s3746_s27  ;;  %v3304_v25 = vpack.i.bf16 %v4278_v10, %v4246_v41 }
  0x74   : > { %3245 = vrot.lane.b32.xlu1 %v3244_v26, %s3751_s28  ;;  %v490_v26 = vsel %vm463_vm1, %v487_v55, %v489_v60  ;;  %v4322_v55 = vsel %vm444_vm3, 0.0, %v492_v16 }
  0x77   : > { %3250 = vrot.lane.b32.xlu0 %v3249_v33, %s3750_s18  ;;  %v3314_v33 = vpack.i.bf16 %v4290_v43, %v4259_v54 }
  0x78   : > { %3255 = vrot.lane.b32.xlu1 %v3254_v34, %s3747_s15 }
  0x7b   : > { %3260 = vrot.lane.b32.xlu0 %v3254_v34, %s3745_s21  ;;  %v4307_v34 = vsel %vm444_vm3, 0.0, %v490_v26 }
  0x7c   : > { %3265 = vrot.lane.b32.xlu1 %v3264_v40, %s3749_s20  ;;  %v3319_v38 = vpack.i.bf16 %v4307_v34, %v4278_v10  ;;  %v3324_v40 = vpack.i.bf16 %v437_v49, %v4210_v21  ;;  %v570_v21 = vsel %vm537_vm4, %v567_v48, %v569_v50  ;;  %v3339_v36 = vpack.i.bf16 %v4322_v55, %v4307_v34 }
  0x7d   : > { %v4344_v50 = vsel %vm536_vm5, 0.0, %v570_v21  ;;  %v517_v21 = vsel %vm463_vm1, 0.0, %v464_v22 }
  0x7f   : > { %3270 = vrot.lane.b32.xlu0 %v3269_v51, %s3748_s23  ;;  %v493_v51 = vrot.slane %v439_v37, 7 }
  0x80   : > { %3275 = vrot.lane.b32.xlu1 %v3274_v53, %s3746_s27  ;;  %v3334_v53 = vpack.i.bf16 %v4295_v27, %v4290_v43 }
  0x83   : > { %3280 = vrot.lane.b32.xlu0 %v3279_v57, %s3751_s28  ;;  %v568_v57 = vsel %vm537_vm4, %v565_v59, %v567_v48 }
  0x84   : > { %3285 = vrot.lane.b32.xlu1 %v3284_v58, %s3750_s18  ;;  %v494_v58 = vsel %vm463_vm1, %v491_v35, %v493_v51 }
  0x85   : > { %v4340_v59 = vsel %vm444_vm3, 0.0, %v494_v58 }
  0x86   : > { %v3354_v8 = vpack.i.bf16 %v4340_v59, %v4322_v55 }
  0x87   : > { %3290 = vrot.lane.b32.xlu0 %v3289_v3, %s3747_s15 }
  0x88   : > { %3295 = vrot.lane.b32.xlu1 %v3289_v3, %s3745_s21  ;;  %v4336_v3 = vsel %vm536_vm5, 0.0, %v568_v57 }
  0x89   : > { %v1109_v60 = vpack.c.bf16 %v4344_v50, %v4336_v3  ;;  %v3349_v49 = vpack.i.bf16 %v4336_v3, %v4295_v27 }
  0x8b   : > { %3300 = vrot.lane.b32.xlu0 %v3299_v18, %s3749_s20  ;;  %v496_v18 = vsel %vm463_vm1, %v493_v51, %v495_v4  ;;  %v3394_v51 = vpack.i.bf16 %v4102_v31, %v4126_v44 }
  0x8c   : > { %3305 = vrot.lane.b32.xlu1 %v3304_v25, %s3748_s23  ;;  %v3359_v25 = vpack.i.bf16 %v439_v37, %v4249_v46  ;;  %v534_v26 = vsel %vm444_vm3, 0.0, %v496_v18  ;;  %v3379_v46 = vpack.i.bf16 %v4126_v44, %v439_v37 }
  0x8d   : > { %v3374_v35 = vpack.i.bf16 %v534_v26, %v4340_v59 }
  0x8f   : > { %3310 = vrot.lane.b32.xlu0 %v3309_v29, %s3746_s27  ;;  %v497_v29 = vrot.slane %v4102_v31, 7  ;;  %v518_v31 = vsel %vm444_vm3, 0.0, %v517_v21 }
  0x90   : > { %3315 = vrot.lane.b32.xlu1 %v3314_v33, %s3751_s28  ;;  %v3369_v33 = vpack.i.bf16 %v4344_v50, %v4336_v3 }
  0x93   : > { %3320 = vrot.lane.b32.xlu0 %v3319_v38, %s3750_s18  ;;  %v498_v38 = vsel %vm463_vm1, %v495_v4, %v497_v29 }
  0x94   : > { %3325 = vrot.lane.b32.xlu1 %v3324_v40, %s3747_s15  ;;  %v535_v16 = vsel %vm444_vm3, 0.0, %v498_v38 }
  0x95   : > { %v3389_v48 = vpack.i.bf16 %v535_v16, %v534_v26 }
  0x97   : > { %3330 = vrot.lane.b32.xlu0 %v3324_v40, %s3745_s21  ;;  %v3384_v40 = vpack.i.bf16 %v4157_v63, %v4344_v50 }
  0x98   : > { %3335 = vrot.lane.b32.xlu1 %v3334_v53, %s3749_s20 }
  0x9b   : > { %3340 = vrot.lane.b32.xlu0 %v3339_v36, %s3748_s23 }
  0x9c   : > { %3345 = vrot.lane.b32.xlu1 %v3344_v62, %s3746_s27 }
  0x9f   : > { %3350 = vrot.lane.b32.xlu0 %v3349_v49, %s3751_s28 }
  0xa0   : > { %3355 = vrot.lane.b32.xlu1 %v3354_v8, %s3750_s18 }
  0xa3   : > { %3360 = vrot.lane.b32.xlu0 %v3359_v25, %s3747_s15 }
  0xa4   : > { %3365 = vrot.lane.b32.xlu1 %v3359_v25, %s3745_s21 }
  0xa7   : > { %3370 = vrot.lane.b32.xlu0 %v3369_v33, %s3749_s20 }
  0xa8   : > { %3375 = vrot.lane.b32.xlu1 %v3374_v35, %s3748_s23 }
  0xab   : > { %3380 = vrot.lane.b32.xlu0 %v3379_v46, %s3746_s27 }
  0xac   : > { %3385 = vrot.lane.b32.xlu1 %v3384_v40, %s3751_s28 }
  0xaf   : > { %3390 = vrot.lane.b32.xlu0 %v3389_v48, %s3750_s18 }
  0xb0   : > { %3395 = vrot.lane.b32.xlu1 %v3394_v51, %s3747_s15 }
  0xb5   : > { %v3121_v53 = vpop.permute.xlu0 %3120 }
  0xb6   : > { %v3126_v37 = vpop.permute.xlu1 %3125  ;;  %v3123_v4 = vunpack.i.h.bf16 %v3121_v53  ;;  %v3122_v49 = vunpack.i.l.bf16 %v3121_v53 }
  0xb7   : > { %v3128_v33 = vunpack.i.h.bf16 %v3126_v37  ;;  %v3127_v35 = vunpack.i.l.bf16 %v3126_v37 }
  0xb8   : > { %v980_v26 = vsel %vm379_vm0, %v518_v31, %v3122_v49  ;;  %v981_v20 = vsel %vm379_vm0, %v3984_v39, %v3123_v4 }
  0xb9   : > { %v3131_v57 = vpop.permute.xlu0 %3130 }
  0xba   : > { %v3136_v58 = vpop.permute.xlu1 %3135 }
  0xbb   : > { %v3138_v40 = vunpack.i.h.bf16 %v3136_v58  ;;  %v3137_v16 = vunpack.i.l.bf16 %v3136_v58  ;;  %v3132_v58 = vunpack.i.l.bf16 %v3131_v57 }
  0xbd   : > { %v4384_v36 = vpop.permute.xlu0 %3140 }
  0xbe   : > { %v3151_v62 = vpop.permute.xlu1 %3150 }
  0xbf   : > { %v3153_v22 = vunpack.i.h.bf16 %v3151_v62  ;;  %v3152_v29 = vunpack.i.l.bf16 %v3151_v62 }
  0xc1   : > { %v3146_v44 = vpop.permute.xlu0 %3145 }
  0xc2   : > { %v3161_v8 = vpop.permute.xlu1 %3160  ;;  %v3148_v18 = vunpack.i.h.bf16 %v3146_v44  ;;  %v3147_v25 = vunpack.i.l.bf16 %v3146_v44  ;;  %v3133_v44 = vunpack.i.h.bf16 %v3131_v57 }
  0xc3   : > { %v3163_v4 = vunpack.i.h.bf16 %v3161_v8  ;;  %v3162_v37 = vunpack.i.l.bf16 %v3161_v8  ;;  %v3143_v8 = vunpack.i.h.bf16 %v4384_v36 }
  0xc4   : > { %v997_v38 = vsel %vm996_vm7, %v980_v26, %v3147_v25  ;;  %v998_v46 = vsel %vm996_vm7, %v981_v20, %v3148_v18  ;;  %v983_v26 = vsel %vm379_vm0, %v4011_v52, %v3138_v40  ;;  %v3142_v52 = vunpack.i.l.bf16 %v4384_v36 }
  0xc5   : > { %v1013_v48 = vsel %vm383_vm2, %v997_v38, %v3152_v29  ;;  %v1014_v51 = vsel %vm383_vm2, %v998_v46, %v3153_v22  ;;  %v3156_v53 = vpop.permute.xlu0 %3155 }
  0xc6   : > { %v3171_v21 = vpop.permute.xlu1 %3170  ;;  %v3158_v49 = vunpack.i.h.bf16 %v3156_v53  ;;  %v3157_v31 = vunpack.i.l.bf16 %v3156_v53  ;;  %v1029_v39 = vsel %vm387_vm6, %v1013_v48, %v3127_v35  ;;  %v1030_v62 = vsel %vm387_vm6, %v1014_v51, %v3128_v33 }
  0xc7   : > { %v982_v33 = vsel %vm379_vm0, %v3989_v42, %v3137_v16  ;;  %v3173_v48 = vunpack.i.h.bf16 %v3171_v21  ;;  %v3172_v51 = vunpack.i.l.bf16 %v3171_v21 }
  0xc8   : > { %v1046_v25 = vsel %vm1045_vm8, %v1029_v39, %v3157_v31  ;;  %v1047_v18 = vsel %vm1045_vm8, %v1030_v62, %v3158_v49 }
  0xc9   : > { %v3166_v20 = vpop.permute.xlu0 %3165  ;;  %v1063_v29 = vsel %vm1062_vm9, %v1046_v25, %v3162_v37  ;;  %v1064_v35 = vsel %vm1062_vm9, %v1047_v18, %v3163_v4 }
  0xca   : > { %v3176_v22 = vpop.permute.xlu1 %3175  ;;  %v3168_v38 = vunpack.i.h.bf16 %v3166_v20  ;;  %v3167_v46 = vunpack.i.l.bf16 %v3166_v20  ;;  %v1080_v57 = vsel %vm1079_vm10, %v1063_v29, %v3132_v58  ;;  %v1081_v53 = vsel %vm1079_vm10, %v1064_v35, %v3133_v44 }
  0xcb   : > { %v1096_v31 = vpack.c.bf16 %v1081_v53, %v1080_v57  ;;  %v3178_v16 = vunpack.i.h.bf16 %v3176_v22  ;;  %v3177_v62 = vunpack.i.l.bf16 %v3176_v22 }
  0xcc   : > { %v1000_v40 = vsel %vm996_vm7, %v983_v26, %v3168_v38  ;;  %v999_v49 = vsel %vm996_vm7, %v982_v33, %v3167_v46 }
  0xcd   : > { %v1015_v39 = vsel %vm383_vm2, %v999_v49, %v3172_v51  ;;  %v1016_v42 = vsel %vm383_vm2, %v1000_v40, %v3173_v48  ;;  %v3181_v4 = vpop.permute.xlu0 %3180  ;;  %1241 = vmatmul.mubr.bf16.vlgmr.msra.gmra.mxu0 %v1096_v31 }
  0xce   : > { %v3186_v37 = vpop.permute.xlu1 %3185  ;;  %v1031_v21 = vsel %vm387_vm6, %v1015_v39, %v3142_v52  ;;  %v1032_v25 = vsel %vm387_vm6, %v1016_v42, %v3143_v8  ;;  %v3183_v44 = vunpack.i.h.bf16 %v3181_v4  ;;  %v3182_v18 = vunpack.i.l.bf16 %v3181_v4  ;;  %2857 = vmatprep.mubr.msk.bf16.mxu0 %vm379_vm0, %v1099_v13 }
  0xcf   : > { %v1048_v36 = vsel %vm1045_vm8, %v1031_v21, %v3177_v62  ;;  %v1049_v58 = vsel %vm1045_vm8, %v1032_v25, %v3178_v16  ;;  %v3188_v26 = vunpack.i.h.bf16 %v3186_v37  ;;  %v3187_v20 = vunpack.i.l.bf16 %v3186_v37 }
  0xd0   : > { %v1065_v22 = vsel %vm1062_vm9, %v1048_v36, %v3182_v18  ;;  %v1066_v29 = vsel %vm1062_vm9, %v1049_v58, %v3183_v44 }
  0xd1   : > { %v3191_v35 = vpop.permute.xlu0 %3190  ;;  %v1082_v8 = vsel %vm1079_vm10, %v1065_v22, %v3187_v20  ;;  %v1083_v38 = vsel %vm1079_vm10, %v1066_v29, %v3188_v26 }
  0xd2   : > { %v3196_v33 = vpop.permute.xlu1 %3195  ;;  %v3193_v46 = vunpack.i.h.bf16 %v3191_v35  ;;  %v3192_v48 = vunpack.i.l.bf16 %v3191_v35  ;;  %v1098_v53 = vpack.c.bf16 %v1083_v38, %v1082_v8 }
  0xd3   : > { %v3198_v51 = vunpack.i.h.bf16 %v3196_v33  ;;  %v3197_v57 = vunpack.i.l.bf16 %v3196_v33 }
  0xd4   : > { %v985_v9 = vsel %vm379_vm0, %v4069_v15, %v3193_v46  ;;  %v984_v24 = vsel %vm379_vm0, %v4031_v61, %v3192_v48 }
  0xd5   : > { %v3201_v13 = vpop.permute.xlu0 %3200  ;;  %1249 = vmatmul.mubr.bf16.gmra.mxu0 %v1098_v53  ;;  %v1002_v31 = vsel %vm996_vm7, %v985_v9, %v3198_v51  ;;  %v1001_v39 = vsel %vm996_vm7, %v984_v24, %v3197_v57 }
  0xd6   : > { %v3206_v52 = vpop.permute.xlu1 %3205  ;;  %v3203_v40 = vunpack.i.h.bf16 %v3201_v13  ;;  %v3202_v49 = vunpack.i.l.bf16 %v3201_v13  ;;  %2858 = vmatprep.mubr.msk.bf16.mxu0 %vm379_vm0, %v1101_v0 }
  0xd7   : > { %v3208_v42 = vunpack.i.h.bf16 %v3206_v52  ;;  %v3207_v16 = vunpack.i.l.bf16 %v3206_v52 }
  0xd8   : > { %v1017_v15 = vsel %vm383_vm2, %v1001_v39, %v3202_v49  ;;  %v1018_v61 = vsel %vm383_vm2, %v1002_v31, %v3203_v40 }
  0xd9   : > { %v3211_v62 = vpop.permute.xlu0 %3210  ;;  %v1033_v25 = vsel %vm387_vm6, %v1017_v15, %v3207_v16  ;;  %v1034_v44 = vsel %vm387_vm6, %v1018_v61, %v3208_v42 }
  0xda   : > { %v3216_v4 = vpop.permute.xlu1 %3215  ;;  %v3213_v37 = vunpack.i.h.bf16 %v3211_v62  ;;  %v3212_v21 = vunpack.i.l.bf16 %v3211_v62 }
  0xdb   : > { %v3218_v18 = vunpack.i.h.bf16 %v3216_v4  ;;  %v3217_v36 = vunpack.i.l.bf16 %v3216_v4 }
  0xdc   : > { %v1050_v58 = vsel %vm1045_vm8, %v1033_v25, %v3212_v21  ;;  %v1051_v45 = vsel %vm1045_vm8, %v1034_v44, %v3213_v37 }
  0xdd   : > { %v3221_v6 = vpop.permute.xlu0 %3220  ;;  %v1067_v22 = vsel %vm1062_vm9, %v1050_v58, %v3217_v36  ;;  %v1068_v29 = vsel %vm1062_vm9, %v1051_v45, %v3218_v18 }
  0xde   : > { %v3226_v0 = vpop.permute.xlu1 %3225  ;;  %v3223_v26 = vunpack.i.h.bf16 %v3221_v6  ;;  %v3222_v20 = vunpack.i.l.bf16 %v3221_v6 }
  0xdf   : > { %v3228_v35 = vunpack.i.h.bf16 %v3226_v0  ;;  %v3227_v33 = vunpack.i.l.bf16 %v3226_v0 }
  0xe0   : > { %v1084_v8 = vsel %vm1079_vm10, %v1067_v22, %v3222_v20  ;;  %v1085_v38 = vsel %vm1079_vm10, %v1068_v29, %v3223_v26 }
  0xe1   : > { %v3231_v46 = vpop.permute.xlu0 %3230  ;;  %v1100_v51 = vpack.c.bf16 %v1085_v38, %v1084_v8  ;;  %v987_v9 = vsel %vm379_vm0, %v4134_v47, %v3228_v35  ;;  %v986_v24 = vsel %vm379_vm0, %v4106_v32, %v3227_v33 }
  0xe2   : > { %v3236_v48 = vpop.permute.xlu1 %3235  ;;  %v3233_v57 = vunpack.i.h.bf16 %v3231_v46  ;;  %v3232_v53 = vunpack.i.l.bf16 %v3231_v46 }
  0xe3   : > { %v3238_v13 = vunpack.i.h.bf16 %v3236_v48  ;;  %v3237_v52 = vunpack.i.l.bf16 %v3236_v48  ;;  %1257 = vmatmul.mubr.bf16.gmra.mxu0 %v1100_v51 }
  0xe4   : > { %v1003_v40 = vsel %vm996_vm7, %v986_v24, %v3232_v53  ;;  %v1004_v49 = vsel %vm996_vm7, %v987_v9, %v3233_v57  ;;  %2859 = vmatprep.mubr.msk.bf16.mxu0 %vm379_vm0, %v1103_v23 }
  0xe5   : > { %v3241_v31 = vpop.permute.xlu0 %3240  ;;  %v1019_v47 = vsel %vm383_vm2, %v1003_v40, %v3237_v52  ;;  %v1020_v32 = vsel %vm383_vm2, %v1004_v49, %v3238_v13 }
  0xe6   : > { %v3246_v39 = vpop.permute.xlu1 %3245  ;;  %v3243_v42 = vunpack.i.h.bf16 %v3241_v31  ;;  %v3242_v16 = vunpack.i.l.bf16 %v3241_v31 }
  0xe7   : > { %v3248_v15 = vunpack.i.h.bf16 %v3246_v39  ;;  %v3247_v61 = vunpack.i.l.bf16 %v3246_v39 }
  0xe8   : > { %v1035_v62 = vsel %vm387_vm6, %v1019_v47, %v3242_v16  ;;  %v1036_v4 = vsel %vm387_vm6, %v1020_v32, %v3243_v42 }
  0xe9   : > { %v3251_v37 = vpop.permute.xlu0 %3250  ;;  %v1052_v44 = vsel %vm1045_vm8, %v1035_v62, %v3247_v61  ;;  %v1053_v18 = vsel %vm1045_vm8, %v1036_v4, %v3248_v15 }
  0xea   : > { %v3256_v21 = vpop.permute.xlu1 %3255  ;;  %v3253_v25 = vunpack.i.h.bf16 %v3251_v37  ;;  %v3252_v11 = vunpack.i.l.bf16 %v3251_v37 }
  0xeb   : > { %v3258_v17 = vunpack.i.h.bf16 %v3256_v21  ;;  %v3257_v23 = vunpack.i.l.bf16 %v3256_v21 }
  0xec   : > { %v1069_v36 = vsel %vm1062_vm9, %v1052_v44, %v3252_v11  ;;  %v1070_v58 = vsel %vm1062_vm9, %v1053_v18, %v3253_v25 }
  0xed   : > { %v3261_v45 = vpop.permute.xlu0 %3260  ;;  %v1086_v0 = vsel %vm1079_vm10, %v1069_v36, %v3257_v23  ;;  %v1087_v26 = vsel %vm1079_vm10, %v1070_v58, %v3258_v17 }
  0xee   : > { %v3266_v6 = vpop.permute.xlu1 %3265  ;;  %v3263_v20 = vunpack.i.h.bf16 %v3261_v45  ;;  %v3262_v22 = vunpack.i.l.bf16 %v3261_v45  ;;  %v1102_v33 = vpack.c.bf16 %v1087_v26, %v1086_v0 }
  0xef   : > { %v3268_v29 = vunpack.i.h.bf16 %v3266_v6  ;;  %v3267_v35 = vunpack.i.l.bf16 %v3266_v6 }
  0xf0   : > { %v989_v8 = vsel %vm379_vm0, %v4190_v12, %v3263_v20  ;;  %v988_v38 = vsel %vm379_vm0, %v4175_v7, %v3262_v22  ;;  %1265 = vmatmul.mubr.bf16.gmra.mxu0 %v1102_v33 }
  0xf1   : > { %v3271_v46 = vpop.permute.xlu0 %3270  ;;  %2860 = vmatprep.mubr.msk.bf16.mxu0 %vm379_vm0, %v1105_v56  ;;  %v1006_v53 = vsel %vm996_vm7, %v989_v8, %v3268_v29  ;;  %v1005_v9 = vsel %vm996_vm7, %v988_v38, %v3267_v35 }
  0xf2   : > { %v3276_v48 = vpop.permute.xlu1 %3275  ;;  %v3273_v51 = vunpack.i.h.bf16 %v3271_v46  ;;  %v3272_v57 = vunpack.i.l.bf16 %v3271_v46 }
  0xf3   : > { %v3278_v24 = vunpack.i.h.bf16 %v3276_v48  ;;  %v3277_v13 = vunpack.i.l.bf16 %v3276_v48 }
  0xf4   : > { %v1021_v12 = vsel %vm383_vm2, %v1005_v9, %v3272_v57  ;;  %v1022_v7 = vsel %vm383_vm2, %v1006_v53, %v3273_v51 }
  0xf5   : > { %v3281_v52 = vpop.permute.xlu0 %3280  ;;  %v1037_v39 = vsel %vm387_vm6, %v1021_v12, %v3277_v13  ;;  %v1038_v30 = vsel %vm387_vm6, %v1022_v7, %v3278_v24 }
  0xf6   : > { %v3286_v40 = vpop.permute.xlu1 %3285  ;;  %v3283_v49 = vunpack.i.h.bf16 %v3281_v52  ;;  %v3282_v31 = vunpack.i.l.bf16 %v3281_v52 }
  0xf7   : > { %v3288_v54 = vunpack.i.h.bf16 %v3286_v40  ;;  %v3287_v56 = vunpack.i.l.bf16 %v3286_v40 }
  0xf8   : > { %v1054_v42 = vsel %vm1045_vm8, %v1037_v39, %v3282_v31  ;;  %v1055_v16 = vsel %vm1045_vm8, %v1038_v30, %v3283_v49 }
  0xf9   : > { %v3291_v47 = vpop.permute.xlu0 %3290  ;;  %v1071_v62 = vsel %vm1062_vm9, %v1054_v42, %v3287_v56  ;;  %v1072_v4 = vsel %vm1062_vm9, %v1055_v16, %v3288_v54 }
  0xfa   : > { %v3296_v32 = vpop.permute.xlu1 %3295  ;;  %v3293_v15 = vunpack.i.h.bf16 %v3291_v47  ;;  %v3292_v61 = vunpack.i.l.bf16 %v3291_v47 }
  0xfb   : > { %v3298_v37 = vunpack.i.h.bf16 %v3296_v32  ;;  %v3297_v21 = vunpack.i.l.bf16 %v3296_v32 }
  0xfc   : > { %v1088_v25 = vsel %vm1079_vm10, %v1071_v62, %v3292_v61  ;;  %v1089_v11 = vsel %vm1079_vm10, %v1072_v4, %v3293_v15 }
  0xfd   : > { %v3301_v17 = vpop.permute.xlu0 %3300  ;;  %v1104_v44 = vpack.c.bf16 %v1089_v11, %v1088_v25  ;;  %v991_v58 = vsel %vm379_vm0, %v4246_v41, %v3298_v37  ;;  %v990_v45 = vsel %vm379_vm0, %v4231_v19, %v3297_v21 }
  0xfe   : > { %v3306_v23 = vpop.permute.xlu1 %3305  ;;  %v3303_v18 = vunpack.i.h.bf16 %v3301_v17  ;;  %v3302_v36 = vunpack.i.l.bf16 %v3301_v17 }
  0xff   : > { %v3308_v6 = vunpack.i.h.bf16 %v3306_v23  ;;  %v3307_v0 = vunpack.i.l.bf16 %v3306_v23  ;;  %1273 = vmatmul.mubr.bf16.gmra.mxu0 %v1104_v44 }
 0x100   : > { %v1007_v26 = vsel %vm996_vm7, %v990_v45, %v3302_v36  ;;  %v1008_v20 = vsel %vm996_vm7, %v991_v58, %v3303_v18  ;;  %2861 = vmatprep.mubr.msk.bf16.mxu0 %vm379_vm0, %v1107_v28 }
 0x101   : > { %v3311_v22 = vpop.permute.xlu0 %3310  ;;  %v1023_v41 = vsel %vm383_vm2, %v1007_v26, %v3307_v0  ;;  %v1024_v19 = vsel %vm383_vm2, %v1008_v20, %v3308_v6 }
 0x102   : > { %v3316_v29 = vpop.permute.xlu1 %3315  ;;  %v3313_v35 = vunpack.i.h.bf16 %v3311_v22  ;;  %v3312_v33 = vunpack.i.l.bf16 %v3311_v22 }
 0x103   : > { %v3318_v8 = vunpack.i.h.bf16 %v3316_v29  ;;  %v3317_v38 = vunpack.i.l.bf16 %v3316_v29 }
 0x104   : > { %v1039_v46 = vsel %vm387_vm6, %v1023_v41, %v3312_v33  ;;  %v1040_v48 = vsel %vm387_vm6, %v1024_v19, %v3313_v35 }
 0x105   : > { %v3321_v51 = vpop.permute.xlu0 %3320  ;;  %v1056_v9 = vsel %vm1045_vm8, %v1039_v46, %v3317_v38  ;;  %v1057_v24 = vsel %vm1045_vm8, %v1040_v48, %v3318_v8 }
 0x106   : > { %v3326_v57 = vpop.permute.xlu1 %3325  ;;  %v3323_v53 = vunpack.i.h.bf16 %v3321_v51  ;;  %v3322_v43 = vunpack.i.l.bf16 %v3321_v51 }
 0x107   : > { %v3328_v27 = vunpack.i.h.bf16 %v3326_v57  ;;  %v3327_v28 = vunpack.i.l.bf16 %v3326_v57 }
 0x108   : > { %v1073_v13 = vsel %vm1062_vm9, %v1056_v9, %v3322_v43  ;;  %v1074_v12 = vsel %vm1062_vm9, %v1057_v24, %v3323_v53 }
 0x109   : > { %v3331_v7 = vpop.permute.xlu0 %3330  ;;  %v1090_v40 = vsel %vm1079_vm10, %v1073_v13, %v3327_v28  ;;  %v1091_v49 = vsel %vm1079_vm10, %v1074_v12, %v3328_v27 }
 0x10a   : > { %v3336_v52 = vpop.permute.xlu1 %3335  ;;  %v3333_v31 = vunpack.i.h.bf16 %v3331_v7  ;;  %v3332_v39 = vunpack.i.l.bf16 %v3331_v7  ;;  %v1106_v56 = vpack.c.bf16 %v1091_v49, %v1090_v40 }
 0x10b   : > { %v3338_v30 = vunpack.i.h.bf16 %v3336_v52  ;;  %v3337_v54 = vunpack.i.l.bf16 %v3336_v52 }
 0x10c   : > { %v993_v42 = vsel %vm379_vm0, %v4307_v34, %v3333_v31  ;;  %v992_v16 = vsel %vm379_vm0, %v4278_v10, %v3332_v39  ;;  %1281 = vmatmul.mubr.bf16.gmra.mxu0 %v1106_v56 }
 0x10d   : > { %v3341_v47 = vpop.permute.xlu0 %3340  ;;  %2862 = vmatprep.mubr.msk.bf16.mxu0 %vm379_vm0, %v1109_v60  ;;  %v1010_v62 = vsel %vm996_vm7, %v993_v42, %v3338_v30  ;;  %v1009_v4 = vsel %vm996_vm7, %v992_v16, %v3337_v54 }
 0x10e   : > { %v3346_v32 = vpop.permute.xlu1 %3345  ;;  %v3343_v15 = vunpack.i.h.bf16 %v3341_v47  ;;  %v3342_v61 = vunpack.i.l.bf16 %v3341_v47 }
 0x10f   : > { %v3348_v37 = vunpack.i.h.bf16 %v3346_v32  ;;  %v3347_v21 = vunpack.i.l.bf16 %v3346_v32 }
 0x110   : > { %v1025_v34 = vsel %vm383_vm2, %v1009_v4, %v3342_v61  ;;  %v1026_v10 = vsel %vm383_vm2, %v1010_v62, %v3343_v15  ;;  %v4548_v15 = vld [vmem:[%s5319_s2] ss:$0 sm:$0xff] }
 0x111   : > { %v3351_v25 = vpop.permute.xlu0 %3350  ;;  %v1041_v44 = vsel %vm387_vm6, %v1025_v34, %v3347_v21  ;;  %v1042_v3 = vsel %vm387_vm6, %v1026_v10, %v3348_v37  ;;  %v4554_v4 = vld [vmem:[%s5320_s3] ss:$0 sm:$0xff] }
 0x112   : > { %v3356_v11 = vpop.permute.xlu1 %3355  ;;  %v3353_v17 = vunpack.i.h.bf16 %v3351_v25  ;;  %v3352_v23 = vunpack.i.l.bf16 %v3351_v25  ;;  %v3583_v25 = vld [vmem:[%s5321_s4 + $0x78] sm:$0xff]  }
 0x113   : > { %v3358_v50 = vunpack.i.h.bf16 %v3356_v11  ;;  %v3357_v60 = vunpack.i.l.bf16 %v3356_v11  ;;  %2946 = vmatprep.subr.bf16.mxu1 %v3583_v25 }
 0x114   : > { %v1058_v18 = vsel %vm1045_vm8, %v1041_v44, %v3352_v23  ;;  %v1059_v36 = vsel %vm1045_vm8, %v1042_v3, %v3353_v17 }
 0x115   : > { %v3361_v58 = vpop.permute.xlu0 %3360  ;;  %v1075_v26 = vsel %vm1062_vm9, %v1058_v18, %v3357_v60  ;;  %v1076_v20 = vsel %vm1062_vm9, %v1059_v36, %v3358_v50  ;;  %v3584_v60 = vld [vmem:[%s5321_s4 + $0x38] sm:$0xff]   ;;  %v3585_v18 = vld [vmem:[%s5321_s4 + $0x70] sm:$0xff]  }
 0x116   : > { %v3366_v45 = vpop.permute.xlu1 %3365  ;;  %v3363_v6 = vunpack.i.h.bf16 %v3361_v58  ;;  %v3362_v0 = vunpack.i.l.bf16 %v3361_v58  ;;  %2947 = vmatpush3.bf16.msra.mxu1 %v3584_v60 }
 0x117   : > { %v3368_v22 = vunpack.i.h.bf16 %v3366_v45  ;;  %v3367_v29 = vunpack.i.l.bf16 %v3366_v45  ;;  %v3586_v45 = vld [vmem:[%s5321_s4 + $0x30] sm:$0xff]   ;;  %2948 = vmatprep.subr.bf16.mxu1 %v3585_v18 }
 0x118   : > { %v1092_v35 = vsel %vm1079_vm10, %v1075_v26, %v3362_v0  ;;  %v1093_v33 = vsel %vm1079_vm10, %v1076_v20, %v3363_v6 }
 0x119   : > { %v3371_v41 = vpop.permute.xlu0 %3370  ;;  %v1108_v8 = vpack.c.bf16 %v1093_v33, %v1092_v35  ;;  %v995_v48 = vsel %vm379_vm0, %v4340_v59, %v3368_v22  ;;  %v994_v51 = vsel %vm379_vm0, %v4322_v55, %v3367_v29  ;;  %v3587_v29 = vld [vmem:[%s5321_s4 + $0x68] sm:$0xff]  }
 0x11a   : > { %v3376_v19 = vpop.permute.xlu1 %3375  ;;  %v3373_v38 = vunpack.i.h.bf16 %v3371_v41  ;;  %v3372_v46 = vunpack.i.l.bf16 %v3371_v41  ;;  %2949 = vmatpush3.bf16.msra.mxu1 %v3586_v45  ;;  %v3588_v41 = vld [vmem:[%s5321_s4 + $0x28] sm:$0xff]  }
 0x11b   : > { %v3378_v57 = vunpack.i.h.bf16 %v3376_v19  ;;  %v3377_v53 = vunpack.i.l.bf16 %v3376_v19  ;;  %1289 = vmatmul.mubr.bf16.gmra.mxu0 %v1108_v8  ;;  %2950 = vmatprep.subr.bf16.mxu1 %v3587_v29  ;;  %v3589_v8 = vld [vmem:[%s5321_s4 + $0x60] sm:$0xff]  }
 0x11c   : > { %v1011_v43 = vsel %vm996_vm7, %v994_v51, %v3372_v46  ;;  %v1012_v27 = vsel %vm996_vm7, %v995_v48, %v3373_v38  ;;  %2863 = vmatprep.mubr.msk.bf16.mxu0 %vm379_vm0, %v1111_v5  ;;  %v4586_v48 = vld [vmem:[#allocation3] sm:$0xff]  ;;  %v3590_v51 = vld [vmem:[%s5321_s4 + $0x20] sm:$0xff]  }
 0x11d   : > { %v3381_v28 = vpop.permute.xlu0 %3380  ;;  %v1027_v59 = vsel %vm383_vm2, %v1011_v43, %v3377_v53  ;;  %v1028_v55 = vsel %vm383_vm2, %v1012_v27, %v3378_v57  ;;  %v1444_v43 = vrot.slane %v4586_v48, 1 }
 0x11e   : > { %v3386_v9 = vpop.permute.xlu1 %3385  ;;  %v3383_v24 = vunpack.i.h.bf16 %v3381_v28  ;;  %v3382_v13 = vunpack.i.l.bf16 %v3381_v28  ;;  %2951 = vmatpush3.bf16.msra.mxu1 %v3588_v41  ;;  %v3591_v28 = vld [vmem:[%s5321_s4 + $0x58] sm:$0xff]  }
 0x11f   : > { %v3388_v12 = vunpack.i.h.bf16 %v3386_v9  ;;  %v3387_v7 = vunpack.i.l.bf16 %v3386_v9  ;;  %2952 = vmatprep.subr.bf16.mxu1 %v3589_v8 }
 0x120   : > { %v1043_v52 = vsel %vm387_vm6, %v1027_v59, %v3382_v13  ;;  %v1044_v40 = vsel %vm387_vm6, %v1028_v55, %v3383_v24  ;;  %v1404_v24 = vrot.slane %v4586_v48, 7  ;;  %v3592_v59 = vld [vmem:[%s5321_s4 + $0x18] sm:$0xff]  }
 0x121   : > { %v3391_v49 = vpop.permute.xlu0 %3390  ;;  %v1060_v30 = vsel %vm1045_vm8, %v1043_v52, %v3387_v7  ;;  %v1061_v54 = vsel %vm1045_vm8, %v1044_v40, %v3388_v12 }
 0x122   : > { %v3396_v31 = vpop.permute.xlu1 %3395  ;;  %v3393_v39 = vunpack.i.h.bf16 %v3391_v49  ;;  %v3392_v63 = vunpack.i.l.bf16 %v3391_v49  ;;  %2953 = vmatpush3.bf16.msra.mxu1 %v3590_v51 }
 0x123   : > { %v3398_v2 = vunpack.i.h.bf16 %v3396_v31  ;;  %v3397_v5 = vunpack.i.l.bf16 %v3396_v31  ;;  %2954 = vmatprep.subr.bf16.mxu1 %v3591_v28  ;;  %v3593_v31 = vld [vmem:[%s5321_s4 + $0x50] sm:$0xff]  }
 0x124   : > { %v1077_v56 = vsel %vm1062_vm9, %v1060_v30, %v3392_v63  ;;  %v1078_v42 = vsel %vm1062_vm9, %v1061_v54, %v3393_v39  ;;  %v3594_v39 = vld [vmem:[%s5321_s4 + $0x10] sm:$0xff]   ;;  %v3595_v54 = vld [vmem:[%s5321_s4 + $0x48] sm:$0xff]  }
 0x125   : > { %v1094_v16 = vsel %vm1079_vm10, %v1077_v56, %v3397_v5  ;;  %v1095_v47 = vsel %vm1079_vm10, %v1078_v42, %v3398_v2 }
 0x126   : > { %v1110_v32 = vpack.c.bf16 %v1095_v47, %v1094_v16  ;;  %2955 = vmatpush3.bf16.msra.mxu1 %v3592_v59 }
 0x127   : > { %2956 = vmatprep.subr.bf16.mxu1 %v3593_v31 }
 0x128   : > { %1297 = vmatmul.mubr.bf16.gmra.mxu0 %v1110_v32 }
 0x12a   : > { %2957 = vmatpush3.bf16.msra.mxu1 %v3594_v39 }
 0x12b   : > { %2958 = vmatprep.subr.bf16.mxu1 %v3595_v54 }
 0x18d   : > { %v1242_v61 = vpop.f32.mrf.mxu0 }
 0x18e   : > { %v1312_v62 = vmul.f32 %v4548_v15, %v1242_v61 }
 0x18f   : > { %v1244_v37 = vpop.f32.mrf.mxu0 }
 0x190   : > { %v1335_v34 = vadd.f32 %v4554_v4, %v1312_v62 }
 0x191   : > { %v1245_v21 = vpop.f32.mrf.mxu0 }
 0x192   : > { %v1313_v10 = vmul.f32 %v4548_v15, %v1245_v21  ;;  %v1351_v44 = vmax.f32 %v1335_v34, 0.0  ;;  %v3596_v34 = vld [vmem:[%s5321_s4 + $0x8] sm:$0xff]  }
 0x193   : > { %v1247_v11 = vpop.f32.mrf.mxu0  ;;  %2959 = vmatpush3.bf16.msra.mxu1 %v3596_v34 }
 0x194   : > { %v1336_v17 = vadd.f32 %v4554_v4, %v1313_v10 }
 0x195   : > { %v1250_v23 = vpop.f32.mrf.mxu0 }
 0x196   : > { %v1352_v3 = vmax.f32 %v1336_v17, 0.0  ;;  %v1314_v50 = vmul.f32 %v4548_v15, %v1250_v23  ;;  %v3597_v17 = vld [vmem:[%s5321_s4 + $0x40] sm:$0xff]  }
 0x197   : > { %v1252_v36 = vpop.f32.mrf.mxu0  ;;  %2960 = vmatprep.subr.bf16.mxu1 %v3597_v17 }
 0x198   : > { %v1367_v58 = vmax.f32 %v1351_v44, %v1352_v3  ;;  %v1337_v0 = vadd.f32 %v4554_v4, %v1314_v50  ;;  %v3598_v44 = vld [vmem:[%s5321_s4] sm:$0xff]  }
 0x199   : > { %v1253_v6 = vpop.f32.mrf.mxu0  ;;  %2961 = vmatpush3.bf16.msra.mxu1 %v3598_v44 }
 0x19a   : > { %1376 = vst.msk [vmem:[#allocation3 + $0x8] sm:$0xff] %vm383_vm2, %v1367_v58  ;;  %v1315_v26 = vmul.f32 %v4548_v15, %v1253_v6  ;;  %v1353_v35 = vmax.f32 %v1337_v0, 0.0  ;;  %2035 = vmatprep.subr.bf16.mxu1 %v3744_v1 }
 0x19b   : > { %v1255_v20 = vpop.f32.mrf.mxu0 }
 0x19c   : > { %v1338_v22 = vadd.f32 %v4554_v4, %v1315_v26 }
 0x19e   : > { %v1354_v33 = vmax.f32 %v1338_v22, 0.0 }
 0x1a0   : > { %v1368_v19 = vmax.f32 %v1353_v35, %v1354_v33 }
 0x1a1   : > { %v1385_v46 = vld [vmem:[#allocation3 + $0x8] sm:$0xff] }
 0x1a2   : > { %1377 = vst.msk [vmem:[#allocation3 + $0x10] sm:$0xff] %vm383_vm2, %v1368_v19  ;;  %v1445_v27 = vrot.slane %v1385_v46, 1  ;;  %v1405_v13 = vrot.slane %v1385_v46, 7  ;;  %v3414_v50 = vpack.i.bf16 %v1385_v46, %v4586_v48 }
 0x1a3   : > { %v1258_v38 = vpop.f32.mrf.mxu0 }
 0x1a4   : > { %v1316_v57 = vmul.f32 %v4548_v15, %v1258_v38  ;;  %v1446_v49 = vsel %vm537_vm4, %v1444_v43, %v1445_v27  ;;  %v1406_v5 = vsel %vm463_vm1, %v1404_v24, %v1405_v13 }
 0x1a5   : > { %v1260_v53 = vpop.f32.mrf.mxu0  ;;  %v1474_v47 = vsel %vm536_vm5, 0.0, %v1446_v49  ;;  %v4630_v37 = vsel %vm444_vm3, 0.0, %v1406_v5 }
 0x1a6   : > { %v1339_v55 = vadd.f32 %v4554_v4, %v1316_v57 }
 0x1a7   : > { %v1261_v9 = vpop.f32.mrf.mxu0 }
 0x1a8   : > { %v1317_v12 = vmul.f32 %v4548_v15, %v1261_v9  ;;  %v1355_v56 = vmax.f32 %v1339_v55, 0.0 }
 0x1a9   : > { %v1263_v7 = vpop.f32.mrf.mxu0  ;;  %v4603_v40 = vld [vmem:[#allocation3 + $0x10] sm:$0xff] }
 0x1aa   : > { %v1340_v52 = vadd.f32 %v4554_v4, %v1317_v12  ;;  %v3399_v63 = vpack.i.bf16 %v4603_v40, %v1385_v46  ;;  %v1447_v2 = vrot.slane %v4603_v40, 1  ;;  %v1407_v30 = vrot.slane %v4603_v40, 7 }
 0x1ac   : > { %v1356_v42 = vmax.f32 %v1340_v52, 0.0  ;;  %3400 = vrot.lane.b32.xlu0 %v3399_v63, %s3746_s27  ;;  %v1448_v16 = vsel %vm537_vm4, %v1445_v27, %v1447_v2  ;;  %v1408_v32 = vsel %vm463_vm1, %v1405_v13, %v1407_v30 }
 0x1ad   : > { %v1475_v62 = vsel %vm536_vm5, 0.0, %v1448_v16  ;;  %v4634_v21 = vsel %vm444_vm3, 0.0, %v1408_v32 }
 0x1ae   : > { %v1369_v61 = vmax.f32 %v1355_v56, %v1356_v42  ;;  %v3404_v10 = vpack.i.bf16 %v1475_v62, %v1474_v47  ;;  %v3409_v25 = vpack.i.bf16 %v4634_v21, %v4630_v37 }
 0x1b0   : > { %1378 = vst.msk [vmem:[#allocation3 + $0x18] sm:$0xff] %vm383_vm2, %v1369_v61  ;;  %3405 = vrot.lane.b32.xlu0 %v3404_v10, %s3750_s18  ;;  %3410 = vrot.lane.b32.xlu1 %v3409_v25, %s3745_s21  ;;  %v1266_v11 = vpop.f32.mrf.mxu0 }
 0x1b1   : > { %v1318_v23 = vmul.f32 %v4548_v15, %v1266_v11 }
 0x1b2   : > { %v1268_v3 = vpop.f32.mrf.mxu0 }
 0x1b3   : > { %v1341_v18 = vadd.f32 %v4554_v4, %v1318_v23 }
 0x1b4   : > { %3415 = vrot.lane.b32.xlu1 %v3414_v50, %s3748_s23  ;;  %v1269_v60 = vpop.f32.mrf.mxu0 }
 0x1b5   : > { %v1319_v36 = vmul.f32 %v4548_v15, %v1269_v60  ;;  %v1357_v20 = vmax.f32 %v1341_v18, 0.0 }
 0x1b6   : > { %v1271_v58 = vpop.f32.mrf.mxu0 }
 0x1b7   : > { %v1387_v45 = vld [vmem:[#allocation3 + $0x18] sm:$0xff]  ;;  %v1342_v6 = vadd.f32 %v4554_v4, %v1319_v36 }
 0x1b8   : > { %v1449_v0 = vrot.slane %v1387_v45, 1  ;;  %v4658_v26 = vpack.i.bf16 %v1387_v45, %v4603_v40  ;;  %v1409_v46 = vrot.slane %v1387_v45, 7 }
 0x1b9   : > { %v1358_v22 = vmax.f32 %v1342_v6, 0.0 }
 0x1ba   : > { %v1450_v29 = vsel %vm537_vm4, %v1447_v2, %v1449_v0  ;;  %v1410_v28 = vsel %vm463_vm1, %v1407_v30, %v1409_v46 }
 0x1bb   : > { %v4663_v35 = vsel %vm536_vm5, 0.0, %v1450_v29  ;;  %v1370_v33 = vmax.f32 %v1357_v20, %v1358_v22  ;;  %v4684_v31 = vsel %vm444_vm3, 0.0, %v1410_v28 }
 0x1bc   : > { %v3419_v41 = vpack.i.bf16 %v4663_v35, %v1475_v62 }
 0x1bd   : > { %1379 = vst.msk [vmem:[#allocation3 + $0x20] sm:$0xff] %vm383_vm2, %v1370_v33 }
 0x1be   : > { %3420 = vrot.lane.b32.xlu0 %v3419_v41, %s3747_s15 }
 0x1bf   : > { %v1274_v19 = vpop.f32.mrf.mxu0 }
 0x1c0   : > { %v1320_v8 = vmul.f32 %v4548_v15, %v1274_v19 }
 0x1c1   : > { %v1276_v38 = vpop.f32.mrf.mxu0 }
 0x1c2   : > { %3425 = vrot.lane.b32.xlu0 %v4658_v26, %s3748_s23  ;;  %v1343_v57 = vadd.f32 %v4554_v4, %v1320_v8 }
 0x1c3   : > { %v1277_v51 = vpop.f32.mrf.mxu0 }
 0x1c4   : > { %v1321_v53 = vmul.f32 %v4548_v15, %v1277_v51  ;;  %v1388_v27 = vld [vmem:[#allocation3 + $0x20] sm:$0xff]  ;;  %v1359_v12 = vmax.f32 %v1343_v57, 0.0 }
 0x1c5   : > { %v1279_v43 = vpop.f32.mrf.mxu0  ;;  %v3429_v13 = vpack.i.bf16 %v1388_v27, %v1387_v45  ;;  %v1451_v59 = vrot.slane %v1388_v27, 1  ;;  %v1411_v55 = vrot.slane %v1388_v27, 7 }
 0x1c6   : > { %v1344_v9 = vadd.f32 %v4554_v4, %v1321_v53 }
 0x1c7   : > { %3430 = vrot.lane.b32.xlu1 %v3429_v13, %s3746_s27  ;;  %v1452_v52 = vsel %vm537_vm4, %v1449_v0, %v1451_v59  ;;  %v1412_v40 = vsel %vm463_vm1, %v1409_v46, %v1411_v55 }
 0x1c8   : > { %v1360_v7 = vmax.f32 %v1344_v9, 0.0  ;;  %v4680_v49 = vsel %vm536_vm5, 0.0, %v1452_v52  ;;  %v4688_v39 = vsel %vm444_vm3, 0.0, %v1412_v40 }
 0x1c9   : > { %v3434_v2 = vpack.i.bf16 %v4680_v49, %v4663_v35  ;;  %v3439_v5 = vpack.i.bf16 %v4688_v39, %v4684_v31  ;;  %v1729_v30 = vpack.c.bf16 %v4680_v49, %v4663_v35 }
 0x1ca   : > { %v1371_v63 = vmax.f32 %v1359_v12, %v1360_v7 }
 0x1cb   : > { %3435 = vrot.lane.b32.xlu1 %v3434_v2, %s3750_s18  ;;  %3440 = vrot.lane.b32.xlu0 %v3439_v5, %s3745_s21 }
 0x1cc   : > { %1380 = vst.msk [vmem:[#allocation3 + $0x28] sm:$0xff] %vm383_vm2, %v1371_v63  ;;  %v1282_v54 = vpop.f32.mrf.mxu0 }
 0x1cd   : > { %v1322_v56 = vmul.f32 %v4548_v15, %v1282_v54 }
 0x1ce   : > { %v1284_v42 = vpop.f32.mrf.mxu0 }
 0x1cf   : > { %v1345_v47 = vadd.f32 %v4554_v4, %v1322_v56 }
 0x1d0   : > { %v1285_v16 = vpop.f32.mrf.mxu0 }
 0x1d1   : > { %v1323_v32 = vmul.f32 %v4548_v15, %v1285_v16  ;;  %v1361_v11 = vmax.f32 %v1345_v47, 0.0 }
 0x1d2   : > { %v1287_v61 = vpop.f32.mrf.mxu0 }
 0x1d3   : > { %v1389_v62 = vld [vmem:[#allocation3 + $0x28] sm:$0xff]  ;;  %v1346_v34 = vadd.f32 %v4554_v4, %v1323_v32 }
 0x1d4   : > { %v4703_v10 = vpack.i.bf16 %v1389_v62, %v1388_v27  ;;  %v1453_v25 = vrot.slane %v1389_v62, 1  ;;  %v1413_v58 = vrot.slane %v1389_v62, 7 }
 0x1d5   : > { %v1362_v17 = vmax.f32 %v1346_v34, 0.0 }
 0x1d6   : > { %3445 = vrot.lane.b32.xlu1 %v4703_v10, %s3748_s23  ;;  %v1454_v23 = vsel %vm537_vm4, %v1451_v59, %v1453_v25  ;;  %v1414_v29 = vsel %vm463_vm1, %v1411_v55, %v1413_v58 }
 0x1d7   : > { %v4710_v44 = vsel %vm536_vm5, 0.0, %v1454_v23  ;;  %v1372_v3 = vmax.f32 %v1361_v11, %v1362_v17  ;;  %v4730_v43 = vsel %vm444_vm3, 0.0, %v1414_v29 }
 0x1d8   : > { %v3449_v50 = vpack.i.bf16 %v4710_v44, %v4680_v49 }
 0x1d9   : > { %1381 = vst.msk [vmem:[#allocation3 + $0x30] sm:$0xff] %vm383_vm2, %v1372_v3 }
 0x1da   : > { %3450 = vrot.lane.b32.xlu1 %v3449_v50, %s3747_s15 }
 0x1db   : > { %v1290_v60 = vpop.f32.mrf.mxu0 }
 0x1dc   : > { %v1324_v18 = vmul.f32 %v4548_v15, %v1290_v60 }
 0x1dd   : > { %v1292_v36 = vpop.f32.mrf.mxu0 }
 0x1de   : > { %v1347_v6 = vadd.f32 %v4554_v4, %v1324_v18 }
 0x1df   : > { %v1293_v45 = vpop.f32.mrf.mxu0 }
 0x1e0   : > { %v1325_v0 = vmul.f32 %v4548_v15, %v1293_v45  ;;  %v1390_v22 = vld [vmem:[#allocation3 + $0x30] sm:$0xff]  ;;  %v1363_v38 = vmax.f32 %v1347_v6, 0.0 }
 0x1e1   : > { %v1295_v20 = vpop.f32.mrf.mxu0  ;;  %v3454_v41 = vpack.i.bf16 %v1390_v22, %v1389_v62  ;;  %v1455_v19 = vrot.slane %v1390_v22, 1  ;;  %v1415_v8 = vrot.slane %v1390_v22, 7 }
 0x1e2   : > { %v1348_v33 = vadd.f32 %v4554_v4, %v1325_v0 }
 0x1e3   : > { %3455 = vrot.lane.b32.xlu0 %v3454_v41, %s3746_s27  ;;  %v1456_v51 = vsel %vm537_vm4, %v1453_v25, %v1455_v19  ;;  %v1416_v57 = vsel %vm463_vm1, %v1413_v58, %v1415_v8 }
 0x1e4   : > { %v1364_v46 = vmax.f32 %v1348_v33, 0.0  ;;  %v4726_v53 = vsel %vm536_vm5, 0.0, %v1456_v51  ;;  %v4734_v27 = vsel %vm444_vm3, 0.0, %v1416_v57 }
 0x1e5   : > { %v3459_v9 = vpack.i.bf16 %v4726_v53, %v4710_v44  ;;  %v3464_v13 = vpack.i.bf16 %v4734_v27, %v4730_v43  ;;  %v1733_v59 = vpack.c.bf16 %v4726_v53, %v4710_v44 }
 0x1e6   : > { %v1373_v28 = vmax.f32 %v1363_v38, %v1364_v46  ;;  %v3509_v38 = vpack.i.bf16 %v4730_v43, %v4688_v39 }
 0x1e7   : > { %3460 = vrot.lane.b32.xlu0 %v3459_v9, %s3750_s18  ;;  %3465 = vrot.lane.b32.xlu1 %v3464_v13, %s3745_s21 }
 0x1e8   : > { %1382 = vst.msk [vmem:[#allocation3 + $0x38] sm:$0xff] %vm383_vm2, %v1373_v28  ;;  %v1298_v55 = vpop.f32.mrf.mxu0 }
 0x1e9   : > { %v1326_v12 = vmul.f32 %v4548_v15, %v1298_v55  ;;  %v1433_v55 = vsel %vm463_vm1, 0.0, %v1404_v24 }
 0x1ea   : > { %v1300_v7 = vpop.f32.mrf.mxu0 }
 0x1eb   : > { %v1349_v40 = vadd.f32 %v4554_v4, %v1326_v12 }
 0x1ec   : > { %v1301_v52 = vpop.f32.mrf.mxu0 }
 0x1ed   : > { %v1327_v63 = vmul.f32 %v4548_v15, %v1301_v52  ;;  %v1365_v42 = vmax.f32 %v1349_v40, 0.0  ;;  %v4758_v15 = vld [vmem:[#allocation3 + $0x48] sm:$0xff] }
 0x1ee   : > { %v1303_v2 = vpop.f32.mrf.mxu0  ;;  %v1461_v34 = vrot.slane %v4758_v15, 1 }
 0x1ef   : > { %v1350_v5 = vadd.f32 %v4554_v4, %v1327_v63  ;;  %v1391_v54 = vld [vmem:[#allocation3 + $0x38] sm:$0xff] }
 0x1f0   : > { %v1457_v56 = vrot.slane %v1391_v54, 1  ;;  %v1417_v4 = vrot.slane %v1391_v54, 7  ;;  %v3489_v41 = vpack.i.bf16 %v1391_v54, %v1390_v22 }
 0x1f1   : > { %v1366_v16 = vmax.f32 %v1350_v5, 0.0  ;;  %v1434_v5 = vsel %vm444_vm3, 0.0, %v1433_v55 }
 0x1f2   : > { %v1458_v47 = vsel %vm537_vm4, %v1455_v19, %v1457_v56  ;;  %v1418_v23 = vsel %vm463_vm1, %v1415_v8, %v1417_v4  ;;  %v3499_v19 = vpack.i.bf16 %v4684_v31, %v4634_v21  ;;  %v1421_v8 = vrot.slane %v4758_v15, 7 }
 0x1f3   : > { %v1374_v32 = vmax.f32 %v1365_v42, %v1366_v16  ;;  %v4752_v61 = vsel %vm536_vm5, 0.0, %v1458_v47  ;;  %v4774_v58 = vsel %vm444_vm3, 0.0, %v1418_v23 }
 0x1f4   : > { %v3469_v62 = vpack.i.bf16 %v4752_v61, %v4726_v53  ;;  %v3519_v46 = vpack.i.bf16 %v4774_v58, %v4734_v27  ;;  %v1473_v53 = vsel %vm537_vm4, %v1461_v34, 0.0 }
 0x1f5   : > { %1383 = vst.msk [vmem:[#allocation3 + $0x40] sm:$0xff] %vm383_vm2, %v1374_v32 }
 0x1f6   : > { %3470 = vrot.lane.b32.xlu0 %v3469_v62, %s3747_s15 }
 0x1fc   : > { %v1392_v25 = vld [vmem:[#allocation3 + $0x40] sm:$0xff] }
 0x1fd   : > { %v3474_v11 = vpack.i.bf16 %v1392_v25, %v1391_v54  ;;  %v1459_v17 = vrot.slane %v1392_v25, 1  ;;  %v1419_v3 = vrot.slane %v1392_v25, 7  ;;  %v3534_v51 = vpack.i.bf16 %v4758_v15, %v1392_v25 }
 0x1ff   : > { %3475 = vrot.lane.b32.xlu1 %v3474_v11, %s3746_s27  ;;  %v1460_v50 = vsel %vm537_vm4, %v1457_v56, %v1459_v17  ;;  %v1420_v60 = vsel %vm463_vm1, %v1417_v4, %v1419_v3  ;;  %v1462_v18 = vsel %vm537_vm4, %v1459_v17, %v1461_v34  ;;  %v1422_v22 = vsel %vm463_vm1, %v1419_v3, %v1421_v8  ;;  %v3603_v8 = vld [vmem:[%s5321_s4 + $0x98] sm:$0xff]  }
 0x200   : > { %v4770_v36 = vsel %vm536_vm5, 0.0, %v1460_v50  ;;  %v1442_v45 = vsel %vm444_vm3, 0.0, %v1420_v60  ;;  %v4783_v20 = vsel %vm536_vm5, 0.0, %v1462_v18  ;;  %v3599_v50 = vld [vmem:[%s5321_s4 + $0xb8] sm:$0xff]   ;;  %v3600_v18 = vld [vmem:[%s5321_s4 + $0xb0] sm:$0xff]  }
 0x201   : > { %v3479_v6 = vpack.i.bf16 %v4770_v36, %v4752_v61  ;;  %v3484_v0 = vpack.i.bf16 %v1442_v45, %v4774_v58  ;;  %v1737_v29 = vpack.c.bf16 %v4770_v36, %v4752_v61  ;;  %v3494_v33 = vpack.i.bf16 %v4783_v20, %v4770_v36 }
 0x203   : > { %3480 = vrot.lane.b32.xlu1 %v3479_v6, %s3750_s18  ;;  %3485 = vrot.lane.b32.xlu0 %v3484_v0, %s3745_s21  ;;  %s3752_s21 = smov [#allocation8]  }
 0x207   : > { %3495 = vrot.lane.b32.xlu1 %v3494_v33, %s3747_s15  ;;  %3490 = vrot.lane.b32.xlu0 %v3489_v41, %s3748_s23  ;;  %v3602_v33 = vld [vmem:[%s5321_s4 + $0xa0] sm:$0xff]   ;;  %s3678_s15 = sshll.u32 %s3752_s21, 4  ;;  %s3679_s15 = int_to_ptr.vmem [resolvable:$false] %s3678_s15 }
 0x208   : > { %s3680_s23 = scalar_lea.vmem %s3679_s15, 512 }
 0x20b   : > { %3505 = vrot.lane.b32.xlu1 %v4658_v26, %s3751_s28  ;;  %3500 = vrot.lane.b32.xlu0 %v3499_v19, %s3749_s20  ;;  %v1443_v26 = vsel %vm444_vm3, 0.0, %v1422_v22 }
 0x20c   : > { %v3529_v57 = vpack.i.bf16 %v1443_v26, %v1442_v45  ;;  %v3601_v45 = vld [vmem:[%s5321_s4 + $0xa8] sm:$0xff]  }
 0x20f   : > { %3515 = vrot.lane.b32.xlu1 %v4703_v10, %s3751_s28  ;;  %3510 = vrot.lane.b32.xlu0 %v3509_v38, %s3749_s20 }
 0x213   : > { %3525 = vrot.lane.b32.xlu1 %v3489_v41, %s3751_s28  ;;  %3520 = vrot.lane.b32.xlu0 %v3519_v46, %s3749_s20 }
 0x217   : > { %3535 = vrot.lane.b32.xlu1 %v3534_v51, %s3751_s28  ;;  %3530 = vrot.lane.b32.xlu0 %v3529_v57, %s3749_s20  ;;  %v3604_v57 = vld [vmem:[%s5321_s4 + $0x90] sm:$0xff]   ;;  %s2846_s28 = sshll.u32 %s3907_s19, 4 }
 0x218   : > { %s377_s29 = scalar_lea.vmem [#allocation8], %s2846_s28 }
 0x21e   : > { %v3401_v10 = vpop.permute.xlu0 %3400 }
 0x21f   : > { %v3403_v16 = vunpack.i.h.bf16 %v3401_v10  ;;  %v3402_v24 = vunpack.i.l.bf16 %v3401_v10 }
 0x222   : > { %v3411_v28 = vpop.permute.xlu1 %3410  ;;  %v3406_v9 = vpop.permute.xlu0 %3405 }
 0x223   : > { %v3408_v12 = vunpack.i.h.bf16 %v3406_v9  ;;  %v3407_v7 = vunpack.i.l.bf16 %v3406_v9  ;;  %v3413_v52 = vunpack.i.h.bf16 %v3411_v28  ;;  %v3412_v40 = vunpack.i.l.bf16 %v3411_v28 }
 0x225   : > { %v1686_v42 = vsel %vm379_vm0, %v3407_v7, %v3412_v40  ;;  %v1687_v48 = vsel %vm379_vm0, %v3408_v12, %v3413_v52  ;;  %v3605_v52 = vld [vmem:[%s5321_s4 + $0x88] sm:$0xff]  }
 0x226   : > { %v3416_v13 = vpop.permute.xlu1 %3415  ;;  %v1694_v4 = vsel %vm387_vm6, %v1686_v42, %v3402_v24  ;;  %v1695_v25 = vsel %vm387_vm6, %v1687_v48, %v3403_v16  ;;  %v3606_v24 = vld [vmem:[%s5321_s4 + $0x80] sm:$0xff]  }
 0x227   : > { %v3418_v63 = vunpack.i.h.bf16 %v3416_v13  ;;  %v3417_v2 = vunpack.i.l.bf16 %v3416_v13 }
 0x229   : > { %v1671_v54 = vsel %vm383_vm2, %v4630_v37, %v3418_v63  ;;  %v1670_v56 = vsel %vm383_vm2, %v1434_v5, %v3417_v2 }
 0x22a   : > { %v1678_v37 = vsel %vm1062_vm9, %v1670_v56, %v3407_v7  ;;  %v1679_v11 = vsel %vm1062_vm9, %v1671_v54, %v3408_v12 }
 0x22b   : > { %v1726_v60 = vpack.c.bf16 %v1679_v11, %v1678_v37  ;;  %v3608_v37 = vld [vmem:[%s5321_s4 + $0xc8] sm:$0xff]  }
 0x230   : > { %v4824_v47 = vpop.permute.xlu0 %3420 }
 0x231   : > { %v3423_v32 = vunpack.i.h.bf16 %v4824_v47  ;;  %v3422_v62 = vunpack.i.l.bf16 %v4824_v47 }
 0x233   : > { %v1702_v17 = vsel %vm1079_vm10, %v1694_v4, %v3422_v62  ;;  %v1703_v23 = vsel %vm1079_vm10, %v1695_v25, %v3423_v32  ;;  %v3607_v25 = vld [vmem:[%s5321_s4 + $0xd0] sm:$0xff]  }
 0x234   : > { %v1727_v3 = vpack.c.bf16 %v1703_v23, %v1702_v17  ;;  %v3426_v0 = vpop.permute.xlu0 %3425  ;;  %v3609_v17 = vld [vmem:[%s5321_s4 + $0xc0] sm:$0xff]  }
 0x235   : > { %v3428_v10 = vunpack.i.h.bf16 %v3426_v0  ;;  %v3427_v28 = vunpack.i.l.bf16 %v3426_v0 }
 0x236   : > { %2002 = vmatprep.mubr.bf16.mxu1 %v1727_v3 }
 0x237   : > { %2003 = vmatmul.mubr.bf16.vlgmr.msra.gmra.mxu1 %v1726_v60  ;;  %v1672_v40 = vsel %vm383_vm2, %v4634_v21, %v3427_v28  ;;  %v1673_v63 = vsel %vm383_vm2, %v4684_v31, %v3428_v10 }
 0x238   : > { %2036 = vmatpush1.bf16.msra.mxu1 %v3599_v50 }
 0x239   : > { %2037 = vmatprep.subr.bf16.mxu1 %v3744_v1  ;;  %v3431_v6 = vpop.permute.xlu1 %3430 }
 0x23a   : > { %v3433_v55 = vunpack.i.h.bf16 %v3431_v6  ;;  %v3432_v12 = vunpack.i.l.bf16 %v3431_v6 }
 0x23c   : > { %2038 = vmatpush1.bf16.msra.mxu1 %v3600_v18 }
 0x23d   : > { %2039 = vmatprep.subr.bf16.mxu1 %v3744_v1  ;;  %v3436_v41 = vpop.permute.xlu1 %3435  ;;  %v3441_v19 = vpop.permute.xlu0 %3440 }
 0x23e   : > { %v3438_v38 = vunpack.i.h.bf16 %v3436_v41  ;;  %v3437_v22 = vunpack.i.l.bf16 %v3436_v41  ;;  %v3443_v46 = vunpack.i.h.bf16 %v3441_v19  ;;  %v3442_v26 = vunpack.i.l.bf16 %v3441_v19 }
 0x240   : > { %2040 = vmatpush1.bf16.msra.mxu1 %v3601_v45  ;;  %v1689_v9 = vsel %vm379_vm0, %v3438_v38, %v3443_v46  ;;  %v1688_v13 = vsel %vm379_vm0, %v3437_v22, %v3442_v26  ;;  %v1680_v42 = vsel %vm1062_vm9, %v1672_v40, %v3437_v22  ;;  %v1681_v48 = vsel %vm1062_vm9, %v1673_v63, %v3438_v38 }
 0x241   : > { %2041 = vmatprep.subr.bf16.mxu1 %v3744_v1  ;;  %v1696_v54 = vsel %vm387_vm6, %v1688_v13, %v3432_v12  ;;  %v1697_v56 = vsel %vm387_vm6, %v1689_v9, %v3433_v55  ;;  %v1730_v4 = vpack.c.bf16 %v1681_v48, %v1680_v42 }
 0x244   : > { %2042 = vmatpush1.bf16.msra.mxu1 %v3602_v33 }
 0x245   : > { %2043 = vmatprep.subr.bf16.mxu1 %v3744_v1 }
 0x248   : > { %v3446_v51 = vpop.permute.xlu1 %3445  ;;  %2044 = vmatpush1.bf16.msra.mxu1 %v3603_v8 }
 0x249   : > { %2045 = vmatprep.subr.bf16.mxu1 %v3744_v1  ;;  %v3448_v6 = vunpack.i.h.bf16 %v3446_v51  ;;  %v3447_v0 = vunpack.i.l.bf16 %v3446_v51 }
 0x24b   : > { %v1675_v22 = vsel %vm383_vm2, %v4730_v43, %v3448_v6 }
 0x24c   : > { %v4863_v7 = vpop.permute.xlu1 %3450  ;;  %2046 = vmatpush1.bf16.msra.mxu1 %v3604_v57 }
 0x24d   : > { %v3453_v2 = vunpack.i.h.bf16 %v4863_v7  ;;  %v3452_v5 = vunpack.i.l.bf16 %v4863_v7  ;;  %2047 = vmatprep.subr.bf16.mxu1 %v3744_v1 }
 0x24f   : > { %v1704_v21 = vsel %vm1079_vm10, %v1696_v54, %v3452_v5  ;;  %v1705_v31 = vsel %vm1079_vm10, %v1697_v56, %v3453_v2 }
 0x250   : > { %v1731_v16 = vpack.c.bf16 %v1705_v31, %v1704_v21  ;;  %2048 = vmatpush1.bf16.msra.mxu1 %v3605_v52 }
 0x251   : > { %2049 = vmatprep.subr.bf16.mxu1 %v3744_v1 }
 0x252   : > { %2010 = vmatprep.mubr.bf16.mxu1 %v1731_v16 }
 0x253   : > { %2011 = vmatmul.mubr.bf16.gmra.mxu1 %v1730_v4 }
 0x254   : > { %2050 = vmatpush1.bf16.msra.mxu1 %v3606_v24 }
 0x255   : > { %2061 = vmatprep.subr.bf16.mxu1 %v3744_v1  ;;  %v3456_v11 = vpop.permute.xlu0 %3455 }
 0x256   : > { %v3458_v19 = vunpack.i.h.bf16 %v3456_v11  ;;  %v3457_v8 = vunpack.i.l.bf16 %v3456_v11 }
 0x258   : > { %2062 = vmatpush2.bf16.msra.mxu1 %v3607_v25 }
 0x259   : > { %2063 = vmatprep.subr.bf16.mxu1 %v3744_v1  ;;  %v3461_v23 = vpop.permute.xlu0 %3460  ;;  %v3466_v3 = vpop.permute.xlu1 %3465 }
 0x25a   : > { %v3463_v50 = vunpack.i.h.bf16 %v3461_v23  ;;  %v3462_v60 = vunpack.i.l.bf16 %v3461_v23  ;;  %v3468_v18 = vunpack.i.h.bf16 %v3466_v3  ;;  %v3467_v45 = vunpack.i.l.bf16 %v3466_v3 }
 0x25c   : > { %2064 = vmatpush2.bf16.msra.mxu1 %v3608_v37  ;;  %v1691_v33 = vsel %vm379_vm0, %v3463_v50, %v3468_v18  ;;  %v1690_v41 = vsel %vm379_vm0, %v3462_v60, %v3467_v45  ;;  %v1683_v28 = vsel %vm1062_vm9, %v1675_v22, %v3463_v50 }
 0x25d   : > { %2065 = vmatprep.subr.bf16.mxu1 %v3744_v1  ;;  %v1674_v1 = vsel %vm383_vm2, %v4688_v39, %v3447_v0  ;;  %v1698_v51 = vsel %vm387_vm6, %v1690_v41, %v3457_v8  ;;  %v1699_v57 = vsel %vm387_vm6, %v1691_v33, %v3458_v19 }
 0x25e   : > { %v1682_v10 = vsel %vm1062_vm9, %v1674_v1, %v3462_v60 }
 0x25f   : > { %v1734_v13 = vpack.c.bf16 %v1683_v28, %v1682_v10 }
 0x260   : > { %2066 = vmatpush2.bf16.msra.mxu1 %v3609_v17 }
 0x268   : > { %v4903_v38 = vpop.permute.xlu0 %3470 }
 0x269   : > { %v3473_v46 = vunpack.i.h.bf16 %v4903_v38  ;;  %v3472_v26 = vunpack.i.l.bf16 %v4903_v38  ;;  %v1483_v38 = vsel %vm536_vm5, 0.0, %v1473_v53 }
 0x26a   : > { %v1741_v15 = vpack.c.bf16 %v1483_v38, %v4783_v20  ;;  %v3610_v20 = vld [vmem:[%s5324_s7 + $0x78] sm:$0xff]  }
 0x26b   : > { %v1706_v9 = vsel %vm1079_vm10, %v1698_v51, %v3472_v26  ;;  %v1707_v39 = vsel %vm1079_vm10, %v1699_v57, %v3473_v46  ;;  %2986 = vmatprep.subr.bf16.mxu0 %v3610_v20  ;;  %v3628_v20 = vld [vmem:[%s5324_s7 + $0xe0] sm:$0xff]  }
 0x26c   : > { %v1735_v43 = vpack.c.bf16 %v1707_v39, %v1706_v9 }
 0x26e   : > { %2018 = vmatprep.mubr.bf16.mxu1 %v1735_v43 }
 0x26f   : > { %2019 = vmatmul.mubr.bf16.gmra.mxu1 %v1734_v13 }
 0x271   : > { %v3476_v55 = vpop.permute.xlu1 %3475 }
 0x272   : > { %v3478_v21 = vunpack.i.h.bf16 %v3476_v55  ;;  %v3477_v31 = vunpack.i.l.bf16 %v3476_v55 }
 0x275   : > { %v3481_v12 = vpop.permute.xlu1 %3480  ;;  %v3486_v52 = vpop.permute.xlu0 %3485 }
 0x276   : > { %v3483_v40 = vunpack.i.h.bf16 %v3481_v12  ;;  %v3482_v63 = vunpack.i.l.bf16 %v3481_v12  ;;  %v3488_v54 = vunpack.i.h.bf16 %v3486_v52  ;;  %v3487_v56 = vunpack.i.l.bf16 %v3486_v52 }
 0x278   : > { %v1693_v42 = vsel %vm379_vm0, %v3483_v40, %v3488_v54  ;;  %v1692_v48 = vsel %vm379_vm0, %v3482_v63, %v3487_v56 }
 0x279   : > { %v4923_v16 = vpop.permute.xlu1 %3495  ;;  %v3491_v24 = vpop.permute.xlu0 %3490  ;;  %v1700_v17 = vsel %vm387_vm6, %v1692_v48, %v3477_v31  ;;  %v1701_v23 = vsel %vm387_vm6, %v1693_v42, %v3478_v21 }
 0x27a   : > { %v3498_v4 = vunpack.i.h.bf16 %v4923_v16  ;;  %v3497_v25 = vunpack.i.l.bf16 %v4923_v16  ;;  %v3493_v37 = vunpack.i.h.bf16 %v3491_v24  ;;  %v3492_v11 = vunpack.i.l.bf16 %v3491_v24  ;;  %v3612_v16 = vld [vmem:[%s5324_s7 + $0x70] sm:$0xff]  }
 0x27c   : > { %v1677_v3 = vsel %vm383_vm2, %v4774_v58, %v3493_v37  ;;  %v1676_v50 = vsel %vm383_vm2, %v4734_v27, %v3492_v11  ;;  %v1708_v60 = vsel %vm1079_vm10, %v1700_v17, %v3497_v25  ;;  %v1709_v18 = vsel %vm1079_vm10, %v1701_v23, %v3498_v4  ;;  %v3619_v37 = vld [vmem:[%s5324_s7 + $0xf8] sm:$0xff]   ;;  %v3614_v17 = vld [vmem:[%s5324_s7 + $0x68] sm:$0xff]   ;;  %v3622_v23 = vld [vmem:[%s5324_s7 + $0xf0] sm:$0xff]  }
 0x27d   : > { %v3506_v45 = vpop.permute.xlu1 %3505  ;;  %v3501_v6 = vpop.permute.xlu0 %3500  ;;  %v1739_v0 = vpack.c.bf16 %v1709_v18, %v1708_v60  ;;  %v1684_v33 = vsel %vm1062_vm9, %v1676_v50, %v3482_v63  ;;  %v1685_v41 = vsel %vm1062_vm9, %v1677_v3, %v3483_v40  ;;  %v3621_v11 = vld [vmem:[%s5324_s7 + $0xb8] sm:$0xff]   ;;  %3014 = vmatprep.subr.bf16.mxu1 %v3619_v37  ;;  %v3623_v3 = vld [vmem:[%s5324_s7 + $0xb0] sm:$0xff]   ;;  %v3615_v50 = vld [vmem:[%s5324_s7 + $0x28] sm:$0xff]  }
 0x27e   : > { %v3503_v19 = vunpack.i.h.bf16 %v3501_v6  ;;  %v3502_v58 = vunpack.i.l.bf16 %v3501_v6  ;;  %v1738_v8 = vpack.c.bf16 %v1685_v41, %v1684_v33  ;;  %v3508_v27 = vunpack.i.h.bf16 %v3506_v45  ;;  %v3616_v60 = vld [vmem:[%s5324_s7 + $0x60] sm:$0xff]   ;;  %v3620_v6 = vld [vmem:[%s5324_s7 + $0x18] sm:$0xff]  }
 0x27f   : > { %2026 = vmatprep.mubr.bf16.mxu1 %v1739_v0  ;;  %v3507_v1 = vunpack.i.l.bf16 %v3506_v45  ;;  %v3617_v18 = vld [vmem:[%s5324_s7 + $0x20] sm:$0xff]   ;;  %v3618_v45 = vld [vmem:[%s5324_s7 + $0x58] sm:$0xff]  }
 0x280   : > { %v1711_v22 = vsel %vm996_vm7, %v3423_v32, %v3503_v19  ;;  %v1710_v51 = vsel %vm996_vm7, %v3422_v62, %v3502_v58  ;;  %2027 = vmatmul.mubr.bf16.gmra.mxu1 %v1738_v8  ;;  %v3631_v37 = vld [vmem:[%s5324_s7 + $0xd8] sm:$0xff]  }
 0x281   : > { %v3511_v57 = vpop.permute.xlu0 %3510  ;;  %2893 = vmatprep.mubr.msk.bf16.mxu1 %vm383_vm2, %v1729_v30  ;;  %v1719_v10 = vsel %vm1045_vm8, %v1711_v22, %v3508_v27  ;;  %v1718_v28 = vsel %vm1045_vm8, %v1710_v51, %v3507_v1  ;;  %v3516_v9 = vpop.permute.xlu1 %3515 }
 0x282   : > { %v3513_v39 = vunpack.i.h.bf16 %v3511_v57  ;;  %v3512_v43 = vunpack.i.l.bf16 %v3511_v57  ;;  %v1728_v13 = vpack.c.bf16 %v1719_v10, %v1718_v28  ;;  %v3518_v32 = vunpack.i.h.bf16 %v3516_v9 }
 0x283   : > { %v3517_v55 = vunpack.i.l.bf16 %v3516_v9 }
 0x284   : > { %v1713_v47 = vsel %vm996_vm7, %v3453_v2, %v3513_v39  ;;  %v1712_v35 = vsel %vm996_vm7, %v3452_v5, %v3512_v43 }
 0x285   : > { %v3521_v49 = vpop.permute.xlu0 %3520  ;;  %v1720_v30 = vsel %vm1045_vm8, %v1712_v35, %v3517_v55  ;;  %v1721_v62 = vsel %vm1045_vm8, %v1713_v47, %v3518_v32  ;;  %v3526_v12 = vpop.permute.xlu1 %3525  ;;  %v5045_v55 = vld [vmem:[%s5322_s5] ss:$0 sm:$0xff] }
 0x286   : > { %v3523_v52 = vunpack.i.h.bf16 %v3521_v49  ;;  %v3522_v40 = vunpack.i.l.bf16 %v3521_v49  ;;  %v1732_v63 = vpack.c.bf16 %v1721_v62, %v1720_v30  ;;  %v3528_v2 = vunpack.i.h.bf16 %v3526_v12  ;;  %v5051_v62 = vld [vmem:[%s5323_s6] ss:$0 sm:$0xff] }
 0x287   : > { %v3527_v54 = vunpack.i.l.bf16 %v3526_v12 }
 0x288   : > { %2068 = vmatmul.mubr.bf16.vlgmr.msra.gmra.mxu1 %v1728_v13  ;;  %v1715_v7 = vsel %vm996_vm7, %v3473_v46, %v3523_v52  ;;  %v1714_v44 = vsel %vm996_vm7, %v3472_v26, %v3522_v40 }
 0x289   : > { %2894 = vmatprep.mubr.msk.bf16.mxu1 %vm383_vm2, %v1733_v59  ;;  %v3531_v59 = vpop.permute.xlu0 %3530  ;;  %v1722_v5 = vsel %vm1045_vm8, %v1714_v44, %v3527_v54  ;;  %v1723_v56 = vsel %vm1045_vm8, %v1715_v7, %v3528_v2  ;;  %v3536_v46 = vpop.permute.xlu1 %3535  ;;  %3015 = vmatpush3.bf16.msra.mxu1 %v3621_v11 }
 0x28a   : > { %v3533_v26 = vunpack.i.h.bf16 %v3531_v59  ;;  %v3532_v42 = vunpack.i.l.bf16 %v3531_v59  ;;  %v1736_v48 = vpack.c.bf16 %v1723_v56, %v1722_v5  ;;  %v3538_v34 = vunpack.i.h.bf16 %v3536_v46  ;;  %3016 = vmatprep.subr.bf16.mxu1 %v3622_v23 }
 0x28b   : > { %v3537_v21 = vunpack.i.l.bf16 %v3536_v46 }
 0x28c   : > { %v1717_v61 = vsel %vm996_vm7, %v3498_v4, %v3533_v26  ;;  %v1716_v36 = vsel %vm996_vm7, %v3497_v25, %v3532_v42  ;;  %v3611_v4 = vld [vmem:[%s5324_s7 + $0x38] sm:$0xff]   ;;  %v3613_v25 = vld [vmem:[%s5324_s7 + $0x30] sm:$0xff]   ;;  %v3625_v42 = vld [vmem:[%s5324_s7 + $0xe8] sm:$0xff]  }
 0x28d   : > { %v1725_v31 = vsel %vm1045_vm8, %v1717_v61, %v3538_v34  ;;  %2987 = vmatpush3.bf16.msra.mxu0 %v3611_v4  ;;  %3017 = vmatpush3.bf16.msra.mxu1 %v3623_v3  ;;  %v3627_v34 = vld [vmem:[%s5324_s7 + $0xa8] sm:$0xff]  }
 0x28e   : > { %2988 = vmatprep.subr.bf16.mxu0 %v3612_v16  ;;  %3018 = vmatprep.subr.bf16.mxu1 %v3625_v42  ;;  %v3629_v16 = vld [vmem:[%s5324_s7 + $0xa0] sm:$0xff]   ;;  %v3632_v3 = vld [vmem:[%s5324_s7 + $0x8] sm:$0xff]  }
 0x290   : > { %2076 = vmatmul.mubr.bf16.gmra.mxu1 %v1732_v63 }
 0x291   : > { %2895 = vmatprep.mubr.msk.bf16.mxu1 %vm383_vm2, %v1737_v29  ;;  %v1724_v29 = vsel %vm1045_vm8, %v1716_v36, %v3537_v21  ;;  %2989 = vmatpush3.bf16.msra.mxu0 %v3613_v25  ;;  %v3630_v25 = vld [vmem:[%s5324_s7 + $0x48] sm:$0xff]  }
 0x292   : > { %v1740_v24 = vpack.c.bf16 %v1725_v31, %v1724_v29  ;;  %2990 = vmatprep.subr.bf16.mxu0 %v3614_v17  ;;  %v3624_v31 = vld [vmem:[%s5324_s7 + $0x50] sm:$0xff]   ;;  %3019 = vmatpush3.bf16.msra.mxu1 %v3627_v34 }
 0x293   : > { %3020 = vmatprep.subr.bf16.mxu1 %v3628_v20 }
 0x295   : > { %2991 = vmatpush3.bf16.msra.mxu0 %v3615_v50 }
 0x296   : > { %2992 = vmatprep.subr.bf16.mxu0 %v3616_v60  ;;  %3021 = vmatpush3.bf16.msra.mxu1 %v3629_v16 }
 0x297   : > { %3022 = vmatprep.subr.bf16.mxu1 %v3631_v37 }
 0x298   : > { %2084 = vmatmul.mubr.bf16.gmra.mxu1 %v1736_v48 }
 0x299   : > { %2896 = vmatprep.mubr.msk.bf16.mxu1 %vm383_vm2, %v1741_v15  ;;  %2993 = vmatpush3.bf16.msra.mxu0 %v3617_v18 }
 0x29a   : > { %2994 = vmatprep.subr.bf16.mxu0 %v3618_v45 }
 0x29d   : > { %2995 = vmatpush3.bf16.msra.mxu0 %v3620_v6  ;;  %v3633_v6 = vld [vmem:[%s5324_s7 + $0x98] sm:$0xff]  }
 0x29e   : > { %2996 = vmatprep.subr.bf16.mxu0 %v3624_v31  ;;  %3023 = vmatpush3.bf16.msra.mxu1 %v3633_v6  ;;  %v3642_v31 = vld [vmem:[%s5324_s7 + $0x118] sm:$0xff]  }
 0x2a0   : > { %2092 = vmatmul.mubr.bf16.gmra.mxu1 %v1740_v24  ;;  %v3626_v24 = vld [vmem:[%s5324_s7 + $0x10] sm:$0xff]  }
 0x2a1   : > { %2997 = vmatpush3.bf16.msra.mxu0 %v3626_v24 }
 0x2a2   : > { %2998 = vmatprep.subr.bf16.mxu0 %v3630_v25 }
 0x2a5   : > { %2999 = vmatpush3.bf16.msra.mxu0 %v3632_v3 }
 0x2f7   : > { %v2962_v0 = vpop.f32.mrf.mxu1 }
 0x2f9   : > { %v2963_v33 = vpop.f32.mrf.mxu1 }
 0x2fa   : > { %v2964_v13 = vadd.f32 %v2963_v33, %v2962_v0  ;;  %v5092_v33 = vld [vmem:[#allocation4] sm:$0xff] }
 0x2fb   : > { %v2965_v41 = vpop.f32.mrf.mxu1 }
 0x2fd   : > { %v2966_v19 = vpop.f32.mrf.mxu1 }
 0x2fe   : > { %v2967_v49 = vadd.f32 %v2966_v19, %v2965_v41 }
 0x313   : > { %v2968_v58 = vpop.f32.mrf.mxu1 }
 0x315   : > { %v2969_v8 = vpop.f32.mrf.mxu1 }
 0x316   : > { %v2970_v63 = vadd.f32 %v2969_v8, %v2968_v58 }
 0x317   : > { %v2971_v27 = vpop.f32.mrf.mxu1 }
 0x319   : > { %v2972_v1 = vpop.f32.mrf.mxu1 }
 0x31a   : > { %v2973_v5 = vadd.f32 %v2972_v1, %v2971_v27 }
 0x32f   : > { %v2974_v22 = vpop.f32.mrf.mxu1 }
 0x331   : > { %v2975_v51 = vpop.f32.mrf.mxu1 }
 0x332   : > { %v2976_v61 = vadd.f32 %v2975_v51, %v2974_v22 }
 0x333   : > { %v2977_v57 = vpop.f32.mrf.mxu1 }
 0x335   : > { %v2978_v10 = vpop.f32.mrf.mxu1 }
 0x336   : > { %v2979_v50 = vadd.f32 %v2978_v10, %v2977_v57  ;;  %v3634_v10 = vld [vmem:[%s5324_s7 + $0xd0] sm:$0xff]  }
 0x337   : > { %3024 = vmatprep.subr.bf16.mxu1 %v3634_v10 }
 0x340   : > { %v5034_v28 = vpop.f32.mrf.mxu1 }
 0x342   : > { %v5036_v9 = vpop.f32.mrf.mxu1 }
 0x343   : > { %v2982_v27 = vadd.f32 %v5036_v9, %v5034_v28  ;;  %v3636_v28 = vld [vmem:[%s5324_s7 + $0x90] sm:$0xff]  }
 0x344   : > { %v5038_v39 = vpop.f32.mrf.mxu1  ;;  %3025 = vmatpush3.bf16.msra.mxu1 %v3636_v28 }
 0x346   : > { %v5040_v43 = vpop.f32.mrf.mxu1 }
 0x348   : > { %v2069_v32 = vpop.f32.mrf.mxu1 }
 0x349   : > { %v2070_v47 = vadd.f32 %v2964_v13, %v2069_v32  ;;  %v3635_v13 = vld [vmem:[%s5324_s7 + $0x40] sm:$0xff]  }
 0x34a   : > { %v2071_v35 = vpop.f32.mrf.mxu1  ;;  %3000 = vmatprep.subr.bf16.mxu0 %v3635_v13  ;;  %v2183_v13 = vrot.slane %v5092_v33, 1 }
 0x34b   : > { %v2107_v30 = vmul.f32 %v5045_v55, %v2070_v47  ;;  %v3637_v47 = vld [vmem:[%s5324_s7] sm:$0xff]   ;;  %v2985_v35 = vadd.f32 %v5040_v43, %v5038_v39  ;;  %v3639_v43 = vld [vmem:[%s5324_s7 + $0x88] sm:$0xff]  }
 0x34c   : > { %v2072_v12 = vpop.f32.mrf.mxu1  ;;  %3001 = vmatpush3.bf16.msra.mxu0 %v3637_v47 }
 0x34d   : > { %v2073_v52 = vadd.f32 %v2967_v49, %v2072_v12  ;;  %v2122_v2 = vadd.f32 %v5051_v62, %v2107_v30  ;;  %v2159_v49 = vrot.slane %v5092_v33, 7  ;;  %3048 = vmatprep.subr.bf16.mxu0 %v3642_v31 }
 0x34e   : > { %v2074_v40 = vpop.f32.mrf.mxu1 }
 0x34f   : > { %v2108_v54 = vmul.f32 %v5045_v55, %v2073_v52  ;;  %v2130_v56 = vmax.f32 %v2122_v2, 0.0 }
 0x350   : > { %v2077_v7 = vpop.f32.mrf.mxu1 }
 0x351   : > { %v2123_v44 = vadd.f32 %v5051_v62, %v2108_v54  ;;  %v2078_v53 = vadd.f32 %v2970_v63, %v2077_v7  ;;  %v3638_v54 = vld [vmem:[%s5324_s7 + $0xc8] sm:$0xff]  }
 0x352   : > { %v2079_v59 = vpop.f32.mrf.mxu1  ;;  %3026 = vmatprep.subr.bf16.mxu1 %v3638_v54 }
 0x353   : > { %v2131_v38 = vmax.f32 %v2123_v44, 0.0  ;;  %v2109_v46 = vmul.f32 %v5045_v55, %v2078_v53  ;;  %3027 = vmatpush3.bf16.msra.mxu1 %v3639_v43 }
 0x354   : > { %v2080_v26 = vpop.f32.mrf.mxu1 }
 0x355   : > { %v2138_v48 = vmax.f32 %v2130_v56, %v2131_v38  ;;  %v2081_v15 = vadd.f32 %v2973_v5, %v2080_v26  ;;  %v2124_v36 = vadd.f32 %v5051_v62, %v2109_v46  ;;  %v3640_v46 = vld [vmem:[%s5324_s7 + $0xc0] sm:$0xff]  }
 0x356   : > { %v2082_v21 = vpop.f32.mrf.mxu1  ;;  %3028 = vmatprep.subr.bf16.mxu1 %v3640_v46 }
 0x357   : > { %2143 = vst.msk [vmem:[#allocation4 + $0x8] sm:$0xff] %vm387_vm6, %v2138_v48  ;;  %v2110_v29 = vmul.f32 %v5045_v55, %v2081_v15  ;;  %v2132_v60 = vmax.f32 %v2124_v36, 0.0  ;;  %v3641_v48 = vld [vmem:[%s5324_s7 + $0x80] sm:$0xff]  }
 0x358   : > { %v2085_v4 = vpop.f32.mrf.mxu1  ;;  %3029 = vmatpush3.bf16.msra.mxu1 %v3641_v48 }
 0x359   : > { %v2125_v11 = vadd.f32 %v5051_v62, %v2110_v29  ;;  %v2086_v17 = vadd.f32 %v2976_v61, %v2085_v4 }
 0x35a   : > { %v2087_v23 = vpop.f32.mrf.mxu1 }
 0x35b   : > { %v2133_v18 = vmax.f32 %v2125_v11, 0.0  ;;  %v2111_v45 = vmul.f32 %v5045_v55, %v2086_v17  ;;  %v5173_v17 = vld [vmem:[#allocation4 + $0x28] sm:$0xff] }
 0x35c   : > { %v2088_v0 = vpop.f32.mrf.mxu1 }
 0x35d   : > { %v2139_v41 = vmax.f32 %v2132_v60, %v2133_v18  ;;  %v2089_v19 = vadd.f32 %v2979_v50, %v2088_v0  ;;  %v2126_v1 = vadd.f32 %v5051_v62, %v2111_v45  ;;  %v2192_v50 = vrot.slane %v5173_v17, 1 }
 0x35e   : > { %v2090_v58 = vpop.f32.mrf.mxu1  ;;  %v5094_v8 = vld [vmem:[#allocation4 + $0x8] sm:$0xff] }
 0x35f   : > { %2144 = vst.msk [vmem:[#allocation4 + $0x10] sm:$0xff] %vm387_vm6, %v2139_v41  ;;  %v2112_v22 = vmul.f32 %v5045_v55, %v2089_v19  ;;  %v3539_v51 = vpack.i.bf16 %v5094_v8, %v5092_v33  ;;  %v2134_v12 = vmax.f32 %v2126_v1, 0.0  ;;  %v2160_v63 = vrot.slane %v5094_v8, 7 }
 0x360   : > { %v2093_v57 = vpop.f32.mrf.mxu1  ;;  %v2184_v29 = vrot.slane %v5094_v8, 1 }
 0x361   : > { %v2127_v9 = vadd.f32 %v5051_v62, %v2112_v22  ;;  %v2094_v32 = vadd.f32 %v2982_v27, %v2093_v57  ;;  %3540 = vrot.lane.b32.xlu1 %v3539_v51, %s3746_s27  ;;  %v2161_v56 = vsel %vm463_vm1, %v2159_v49, %v2160_v63 }
 0x362   : > { %v2095_v30 = vpop.f32.mrf.mxu1 }
 0x363   : > { %v2135_v52 = vmax.f32 %v2127_v9, 0.0  ;;  %v2113_v40 = vmul.f32 %v5045_v55, %v2094_v32  ;;  %v2176_v9 = vsel %vm463_vm1, 0.0, %v2159_v49  ;;  %v2185_v30 = vsel %vm537_vm4, %v2183_v13, %v2184_v29 }
 0x364   : > { %v2096_v2 = vpop.f32.mrf.mxu1  ;;  %v2201_v54 = vsel %vm536_vm5, 0.0, %v2185_v30 }
 0x365   : > { %v2140_v7 = vmax.f32 %v2134_v12, %v2135_v52  ;;  %v2097_v39 = vadd.f32 %v2985_v35, %v2096_v2  ;;  %v2128_v59 = vadd.f32 %v5051_v62, %v2113_v40  ;;  %v2177_v35 = vsel %vm444_vm3, 0.0, %v2176_v9 }
 0x366   : > { %v2098_v44 = vpop.f32.mrf.mxu1  ;;  %v5128_v53 = vld [vmem:[#allocation4 + $0x10] sm:$0xff] }
 0x367   : > { %2145 = vst.msk [vmem:[#allocation4 + $0x18] sm:$0xff] %vm387_vm6, %v2140_v7  ;;  %v2114_v5 = vmul.f32 %v5045_v55, %v2097_v39  ;;  %v2162_v38 = vrot.slane %v5128_v53, 7  ;;  %v2178_v55 = vsel %vm444_vm3, 0.0, %v2161_v56  ;;  %v2136_v34 = vmax.f32 %v2128_v59, 0.0 }
 0x368   : > { %v2168_v56 = vrot.slane %v5173_v17, 7 }
 0x369   : > { %v2129_v26 = vadd.f32 %v5051_v62, %v2114_v5  ;;  %v2163_v42 = vsel %vm463_vm1, %v2160_v63, %v2162_v38  ;;  %v2186_v62 = vrot.slane %v5128_v53, 1  ;;  %v3643_v5 = vld [vmem:[%s5324_s7 + $0x110] sm:$0xff]  }
 0x36a   : > { %v5149_v15 = vsel %vm444_vm3, 0.0, %v2163_v42 }
 0x36b   : > { %v2137_v21 = vmax.f32 %v2129_v26, 0.0  ;;  %v3544_v61 = vpack.i.bf16 %v5149_v15, %v2178_v55  ;;  %v2187_v4 = vsel %vm537_vm4, %v2184_v29, %v2186_v62 }
 0x36c   : > { %v2202_v37 = vsel %vm536_vm5, 0.0, %v2187_v4 }
 0x36d   : > { %v2141_v36 = vmax.f32 %v2136_v34, %v2137_v21  ;;  %3545 = vrot.lane.b32.xlu0 %v3544_v61, %s3746_s27  ;;  %v3644_v34 = vld [vmem:[%s5324_s7 + $0x108] sm:$0xff]  }
 0x36e   : > { %v5158_v24 = vld [vmem:[#allocation4 + $0x18] sm:$0xff] }
 0x36f   : > { %2146 = vst.msk [vmem:[#allocation4 + $0x20] sm:$0xff] %vm387_vm6, %v2141_v36  ;;  %v3549_v20 = vpack.i.bf16 %v5158_v24, %v5128_v53  ;;  %v2188_v16 = vrot.slane %v5158_v24, 1  ;;  %v2164_v3 = vrot.slane %v5158_v24, 7 }
 0x371   : > { %3550 = vrot.lane.b32.xlu0 %v3549_v20, %s3746_s27  ;;  %v2189_v25 = vsel %vm537_vm4, %v2186_v62, %v2188_v16  ;;  %v2165_v45 = vsel %vm463_vm1, %v2162_v38, %v2164_v3  ;;  %v3645_v20 = vld [vmem:[%s5324_s7 + $0x100] sm:$0xff]  }
 0x372   : > { %v5171_v11 = vsel %vm536_vm5, 0.0, %v2189_v25  ;;  %v2180_v27 = vsel %vm444_vm3, 0.0, %v2165_v45 }
 0x373   : > { %v3554_v23 = vpack.i.bf16 %v5171_v11, %v2202_v37 }
 0x375   : > { %3555 = vrot.lane.b32.xlu1 %v3554_v23, %s3746_s27 }
 0x376   : > { %v5179_v60 = vld [vmem:[#allocation4 + $0x20] sm:$0xff] }
 0x377   : > { %v3564_v18 = vpack.i.bf16 %v5173_v17, %v5179_v60  ;;  %v2166_v6 = vrot.slane %v5179_v60, 7  ;;  %v2190_v0 = vrot.slane %v5179_v60, 1 }
 0x379   : > { %3565 = vrot.lane.b32.xlu1 %v3564_v18, %s3746_s27  ;;  %v2167_v41 = vsel %vm463_vm1, %v2164_v3, %v2166_v6  ;;  %v2191_v19 = vsel %vm537_vm4, %v2188_v16, %v2190_v0  ;;  %v2193_v58 = vsel %vm537_vm4, %v2190_v0, %v2192_v50 }
 0x37a   : > { %v2181_v1 = vsel %vm444_vm3, 0.0, %v2167_v41  ;;  %v5198_v51 = vsel %vm536_vm5, 0.0, %v2191_v19  ;;  %v5202_v57 = vsel %vm536_vm5, 0.0, %v2193_v58  ;;  %v2200_v58 = vsel %vm537_vm4, %v2192_v50, 0.0 }
 0x37b   : > { %v3559_v22 = vpack.i.bf16 %v2181_v1, %v2180_v27  ;;  %v3569_v10 = vpack.i.bf16 %v5202_v57, %v5198_v51  ;;  %v2275_v19 = vpack.c.bf16 %v5198_v51, %v5171_v11 }
 0x37d   : > { %3560 = vrot.lane.b32.xlu0 %v3559_v22, %s3746_s27 }
 0x381   : > { %3570 = vrot.lane.b32.xlu0 %v3569_v10, %s3746_s27  ;;  %v2206_v10 = vsel %vm536_vm5, 0.0, %v2200_v58  ;;  %s2765_s27 = sshll.u32 %s377_s29, 4  ;;  %s5274_s27 = int_to_ptr.vmem [resolvable:$true] %s2765_s27 }
 0x382   : > { %s3674_s12 = scalar_lea.vmem %s5274_s27, 256  ;;  %p3681_p5 = scmp.lt.s32.totalorder %s5274_s27, %s3679_s15 }
 0x383   : > { %p3675_p11 = scmp.ne.s32.totalorder %s5274_s27, %s3674_s12  ;;  %p3682_p7 = scmp.lt.s32.totalorder %s3680_s23, %s3674_s12 }
 0x385   : > { %p3676_p13 = pnand %p3675_p11, %p5342_p12  ;;  %p3683_p8 = por %p3682_p7, %p3681_p5 }
 0x387   : > { %p3677_p4 = pneg %p3676_p13 }
 0x389   : > { %p3684_p10 = pnand %p3683_p8, %p3677_p4 }
 0x3d3   : > { %v3541_v28 = vpop.permute.xlu1 %3540 }
 0x3d4   : > { %v3543_v32 = vunpack.i.h.bf16 %v3541_v28  ;;  %v3542_v47 = vunpack.i.l.bf16 %v3541_v28 }
 0x3d6   : > { %v2257_v63 = vsel %vm387_vm6, %v2177_v35, %v3542_v47  ;;  %v2258_v2 = vsel %vm387_vm6, %v2178_v55, %v3543_v32 }
 0x3d7   : > { %v2271_v43 = vpack.c.bf16 %v2258_v2, %v2257_v63 }
 0x3df   : > { %v3546_v12 = vpop.permute.xlu0 %3545 }
 0x3e0   : > { %v3548_v52 = vunpack.i.h.bf16 %v3546_v12  ;;  %v3547_v40 = vunpack.i.l.bf16 %v3546_v12 }
 0x3e2   : > { %v2261_v33 = vsel %vm387_vm6, %v2201_v54, %v3547_v40  ;;  %v2262_v49 = vsel %vm387_vm6, %v2202_v37, %v3548_v52 }
 0x3e3   : > { %v3551_v7 = vpop.permute.xlu0 %3550  ;;  %v2272_v39 = vpack.c.bf16 %v2262_v49, %v2261_v33 }
 0x3e4   : > { %v3553_v44 = vunpack.i.h.bf16 %v3551_v7  ;;  %v3552_v59 = vunpack.i.l.bf16 %v3551_v7  ;;  %v2937_v7 = vld [vmem:[%s5325_s8] ss:$0 sm:$0xff] }
 0x3e5   : > { %2606 = vmatprep.mubr.bf16.mxu0 %v2272_v39 }
 0x3e6   : > { %2607 = vmatmul.mubr.bf16.vlgmr.msra.gmra.mxu0 %v2271_v43  ;;  %v2259_v38 = vsel %vm387_vm6, %v5149_v15, %v3552_v59  ;;  %v2260_v46 = vsel %vm387_vm6, %v2180_v27, %v3553_v44  ;;  %v2169_v15 = vsel %vm463_vm1, %v2166_v6, %v2168_v56 }
 0x3e7   : > { %v3556_v26 = vpop.permute.xlu1 %3555  ;;  %v2274_v42 = vpack.c.bf16 %v2260_v46, %v2259_v38  ;;  %3049 = vmatpush3.bf16.msra.mxu0 %v3642_v31  ;;  %v2182_v4 = vsel %vm444_vm3, 0.0, %v2169_v15 }
 0x3e8   : > { %v3558_v48 = vunpack.i.h.bf16 %v3556_v26  ;;  %v3557_v55 = vunpack.i.l.bf16 %v3556_v26  ;;  %3050 = vmatprep.subr.bf16.mxu0 %v3643_v5 }
 0x3e9   : > { %2655 = vmatprep.mubr.bf16.mxu1 %v2274_v42 }
 0x3ea   : > { %v2266_v21 = vsel %vm387_vm6, %v5128_v53, %v3558_v48  ;;  %v2265_v61 = vsel %vm387_vm6, %v5094_v8, %v3557_v55  ;;  %v2938_v55 = vld [vmem:[%s5326_s9] ss:$0 sm:$0xff] }
 0x3eb   : > { %v2273_v62 = vpack.c.bf16 %v2266_v21, %v2265_v61  ;;  %v3566_v36 = vpop.permute.xlu1 %3565  ;;  %3051 = vmatpush3.bf16.msra.mxu0 %v3643_v5 }
 0x3ec   : > { %v3568_v29 = vunpack.i.h.bf16 %v3566_v36  ;;  %v3567_v31 = vunpack.i.l.bf16 %v3566_v36  ;;  %3052 = vmatprep.subr.bf16.mxu0 %v3644_v34 }
 0x3ed   : > { %2656 = vmatmul.mubr.bf16.vlgmr.msra.gmra.mxu1 %v2273_v62 }
 0x3ee   : > { %v2269_v53 = vsel %vm387_vm6, %v2181_v1, %v3567_v31  ;;  %v2270_v8 = vsel %vm387_vm6, %v2182_v4, %v3568_v29 }
 0x3ef   : > { %v3561_v16 = vpop.permute.xlu0 %3560  ;;  %v2278_v25 = vpack.c.bf16 %v2270_v8, %v2269_v53  ;;  %3053 = vmatpush3.bf16.msra.mxu0 %v3644_v34 }
 0x3f0   : > { %v3563_v37 = vunpack.i.h.bf16 %v3561_v16  ;;  %v3562_v23 = vunpack.i.l.bf16 %v3561_v16  ;;  %3054 = vmatprep.subr.bf16.mxu0 %v3645_v20 }
 0x3f1   : > { %2663 = vmatprep.mubr.bf16.mxu1 %v2278_v25 }
 0x3f2   : > { %v2263_v3 = vsel %vm387_vm6, %v5171_v11, %v3562_v23  ;;  %v2264_v18 = vsel %vm387_vm6, %v5198_v51, %v3563_v37  ;;  %v2279_v11 = vpack.c.bf16 %v2206_v10, %v5202_v57 }
 0x3f3   : > { %v3571_v45 = vpop.permute.xlu0 %3570  ;;  %v2276_v6 = vpack.c.bf16 %v2264_v18, %v2263_v3  ;;  %3055 = vmatpush3.bf16.msra.mxu0 %v3645_v20 }
 0x3f4   : > { %v3573_v0 = vunpack.i.h.bf16 %v3571_v45  ;;  %v3572_v41 = vunpack.i.l.bf16 %v3571_v45 }
 0x3f5   : > { %2614 = vmatprep.mubr.bf16.mxu0 %v2276_v6 }
 0x3f6   : > { %2615 = vmatmul.mubr.bf16.gmra.mxu0 %v2274_v42  ;;  %v2267_v27 = vsel %vm387_vm6, %v5158_v24, %v3572_v41  ;;  %v2268_v1 = vsel %vm387_vm6, %v5179_v60, %v3573_v0 }
 0x3f7   : > { %3056 = vmatprep.mubr.msk.bf16.mxu0 %vm387_vm6, %v2275_v19  ;;  %v2277_v22 = vpack.c.bf16 %v2268_v1, %v2267_v27 }
 0x3f9   : > { %2664 = vmatmul.mubr.bf16.gmra.mxu1 %v2277_v22 }
 0x3fe   : > { %3057 = vmatmul.mubr.msk.bf16.vlgmr.msra.gmra.mxu0 %vm387_vm6, %v2279_v11 }
 0x4a6   : > { %v3002_v17 = vpop.f32.mrf.mxu0 }
 0x4a8   : > { %v3003_v50 = vpop.f32.mrf.mxu0 }
 0x4a9   : > { %v3004_v57 = vadd.f32 %v3003_v50, %v3002_v17 }
 0x4aa   : > { %v3005_v28 = vpop.f32.mrf.mxu0 }
 0x4ac   : > { %v3006_v9 = vpop.f32.mrf.mxu0 }
 0x4ad   : > { %v3030_v51 = vpop.f32.mrf.mxu1  ;;  %v3007_v38 = vadd.f32 %v3006_v9, %v3005_v28 }
 0x4af   : > { %v3031_v13 = vpop.f32.mrf.mxu1 }
 0x4b0   : > { %v3032_v12 = vadd.f32 %v3031_v13, %v3030_v51 }
 0x4b1   : > { %v3033_v24 = vpop.f32.mrf.mxu1 }
 0x4b2   : > { %v2658_v43 = vadd.f32 %v3032_v12, %v3004_v57 }
 0x4b3   : > { %v3034_v60 = vpop.f32.mrf.mxu1 }
 0x4b4   : > { %v3035_v49 = vadd.f32 %v3034_v60, %v3033_v24 }
 0x4b6   : > { %v3008_v32 = vpop.f32.mrf.mxu0  ;;  %v2661_v21 = vadd.f32 %v3035_v49, %v3007_v38 }
 0x4b8   : > { %v3009_v47 = vpop.f32.mrf.mxu0 }
 0x4b9   : > { %v3036_v35 = vpop.f32.mrf.mxu1  ;;  %v3010_v52 = vadd.f32 %v3009_v47, %v3008_v32 }
 0x4ba   : > { %v3011_v30 = vpop.f32.mrf.mxu0 }
 0x4bb   : > { %v3037_v14 = vpop.f32.mrf.mxu1 }
 0x4bc   : > { %v3038_v40 = vadd.f32 %v3037_v14, %v3036_v35  ;;  %v3012_v63 = vpop.f32.mrf.mxu0 }
 0x4bd   : > { %v3039_v2 = vpop.f32.mrf.mxu1  ;;  %v3013_v44 = vadd.f32 %v3012_v63, %v3011_v30 }
 0x4be   : > { %v2666_v54 = vadd.f32 %v3038_v40, %v3010_v52  ;;  %v3058_v33 = vpop.f32.mrf.mxu0 }
 0x4bf   : > { %v3040_v39 = vpop.f32.mrf.mxu1 }
 0x4c0   : > { %v2715_v59 = vadd.f32 %v3058_v33, %v2666_v54  ;;  %v3041_v5 = vadd.f32 %v3040_v39, %v3039_v2  ;;  %v2706_v56 = vpop.f32.mrf.mxu0 }
 0x4c1   : > { %v2707_v46 = vadd.f32 %v2706_v56, %v2658_v43 }
 0x4c2   : > { %v2730_v26 = vmul.f32 %v2937_v7, %v2715_v59  ;;  %v2669_v42 = vadd.f32 %v3041_v5, %v3013_v44  ;;  %v3059_v48 = vpop.f32.mrf.mxu0 }
 0x4c3   : > { %v2728_v34 = vmul.f32 %v2937_v7, %v2707_v46 }
 0x4c4   : > { %v2718_v61 = vadd.f32 %v3059_v48, %v2669_v42  ;;  %v2709_v15 = vpop.f32.mrf.mxu0  ;;  %v2741_v36 = vadd.f32 %v2938_v55, %v2730_v26 }
 0x4c5   : > { %v2710_v62 = vadd.f32 %v2709_v15, %v2661_v21  ;;  %v2739_v31 = vadd.f32 %v2938_v55, %v2728_v34 }
 0x4c6   : > { %v2731_v29 = vmul.f32 %v2937_v7, %v2718_v61  ;;  %v2745_v8 = vmax.f32 %v2741_v36, 0.0 }
 0x4c7   : > { %v2729_v20 = vmul.f32 %v2937_v7, %v2710_v62  ;;  %v2743_v25 = vmax.f32 %v2739_v31, 0.0 }
 0x4c8   : > { %v2742_v4 = vadd.f32 %v2938_v55, %v2731_v29 }
 0x4c9   : > { %v2740_v53 = vadd.f32 %v2938_v55, %v2729_v20 }
 0x4ca   : > { %v2746_v16 = vmax.f32 %v2742_v4, 0.0 }
 0x4cb   : > { %v2744_v37 = vmax.f32 %v2740_v53, 0.0 }
 0x4cc   : > { %v2748_v23 = vmax.f32 %v2745_v8, %v2746_v16 }
 0x4cd   : > { %v2747_v3 = vmax.f32 %v2743_v25, %v2744_v37 }
 0x4ce   : > { %2750 = vst [vmem:[%s377_s29 + $0x8] sm:$0xff] %v2748_v23 }
 0x4cf   : > { %2749 = vst [vmem:[%s377_s29] sm:$0xff] %v2747_v3 }
 0x4d0   : > { %3687 = shalt.err (!%p3684_p10)
}
 0x4d1   : > { %s3688_s20 = scalar_lea.hbm %s5272_s24, 256  ;;  %s3692_s30 = scalar_lea.hbm %s5327_s10, 512 }
 0x4d2   : > { %p3689_p0 = scmp.ne.s32.totalorder %s5272_s24, %s3688_s20  ;;  %p3693_p1 = scmp.lt.s32.totalorder %s5272_s24, %s5327_s10 }
 0x4d3   : > { %p3694_p3 = scmp.lt.s32.totalorder %s3692_s30, %s3688_s20 }
 0x4d4   : > { %p3690_p2 = pnand %p3689_p0, %p5342_p12 }
 0x4d5   : > { %p3695_p6 = por %p3694_p3, %p3693_p1 }
 0x4d6   : > { %p3691_p9 = pneg %p3690_p2 }
 0x4d8   : > { %p3696_p11 = pnand %p3695_p6, %p3691_p9 }
 0x4da   : > { %3699 = shalt.err (!%p3696_p11)
}
 0x4db   : > { %s3753_s22 = smov 128   ;;  %s3754_s12 = smov 8  }
 0x4dc   : > { %3062 = dma.vmem_to_hbm [thread:$0]  (%p5342_p12), %s5274_s27, 256, %s5272_s24, %s2752_s17, %s3753_s22, %s3753_s22, %s3754_s12  }
 0x4dd PF: > { %s2780_s21 = sand.u32 1, %s3726_s13   ;;  %p5343_p13 = scmp.ne.s32.totalorder %s5339_s26, 0 }
 0x4de   : > { %p5344_p4 = scmp.ge.s32.totalorder %s3738_s16, 2  ;;  %s2781_s15 = scalar_lea.sflag [#allocation7], %s2780_s21 }
 0x4e0   : > { %p3069_p5 = pnand %p5344_p4, %p5343_p13 }
 0x4e2   : > { %p3070_p7 = pneg %p3069_p5 }
 0x4e4   : > { %3721 = dma.done.wait (%p3070_p7), %s2781_s15, 256  }
 0x4e5   : > { %3723 = vsyncadd (%p3070_p7), %s2781_s15, 4294967040  ;;  %s5345_s16 = sld [smem:[#allocation12_spill]]  ;;  %s5348_s13 = smov %s3730_s14 }
 0x4e6   : > { %s5346_s23 = sld [smem:[#allocation11_spill]] }
 0x4e7   : > { %s5347_s15 = sld [smem:[#allocation13_spill]] }
 0x4eb   : > { %p23_p8 = scmp.ge.s32.totalorder %s5345_s16, 4  }
 0x4ec   : > { %s5349_s14 = smov %s5346_s23 }
 0x4ed   :  { %25 = sbr.rel (!%p23_p8) target bundleno = 5 (0x5), region = 111 }
 0x4f2   :  { %2786 = vsyncpa [#allocation6], 1 }
 0x4f3   :  { %2788 = vsyncpa [#allocation6 + $0x1], 1 }
 0x4f4   :  { %2789 = vsyncpa [#allocation7], 1 }
 0x4f5   :  { %2791 = vsyncpa [#allocation7 + $0x1], 1 }

</bundles_post_ra>
